<compile_context>
chip_gen: v5e
topology: v5e:2x2
jax: 0.10.0
libtpu: 0.0.40
codegen_flags: <defaults>
</compile_context>

<pallas_src>
import functools
import math

import jax
import jax.numpy as jnp
from jax.experimental import pallas as pl
from jax.experimental.pallas import tpu as pltpu


# ----------------------------------------------------------------------------
# In-kernel helpers
# ----------------------------------------------------------------------------
def _layer_norm(x, gamma, beta, eps=1e-5):
    # PyTorch nn.LayerNorm over the last dim: biased variance, eps=1e-5.
    mu = jnp.mean(x, axis=-1, keepdims=True)
    xc = x - mu
    var = jnp.mean(xc * xc, axis=-1, keepdims=True)
    return xc * jax.lax.rsqrt(var + eps) * gamma + beta


# ----------------------------------------------------------------------------
# Pallas kernel: one (batch block, layer) step of the decoder stack
# ----------------------------------------------------------------------------
def decoder_kernel(pad_ref, h_ref,
                   wq_ref, wk_ref, wv_ref, wfc_ref,
                   ln1g_ref, ln1b_ref,
                   w1_ref, w2_ref,
                   ln2g_ref, ln2b_ref,
                   out_ref, attn_ref,
                   *, n_heads, d_k, d_v, use_bf16):
    layer = pl.program_id(1)

    # Load the HBM hidden block only at layer 0; afterwards out_ref itself is
    # the resident layer-to-layer carry (its block index is constant over the
    # layer axis, so it lives in VMEM and is written back to HBM only when the
    # batch block changes).
    @pl.when(layer == 0)
    def _():
        out_ref[...] = h_ref[...]

    Bb, L, D = out_ref.shape
    H = n_heads
    mm = jnp.bfloat16 if use_bf16 else jnp.float32

    x = out_ref[...].reshape(Bb * L, D)            # [Bb*L, D] token-major
    xm = x.astype(mm)

    # --- QKV projections: full-width MXU matmuls with M = Bb*L ---
    q = jnp.dot(xm, wq_ref[0].astype(mm), preferred_element_type=jnp.float32)
    k = jnp.dot(xm, wk_ref[0].astype(mm), preferred_element_type=jnp.float32)
    v = jnp.dot(xm, wv_ref[0].astype(mm), preferred_element_type=jnp.float32)

    # --- pad + causal mask rebuilt in-kernel (no [L, L] mask DMA) ---
    row = jax.lax.broadcasted_iota(jnp.int32, (L, L), 0)
    col = jax.lax.broadcasted_iota(jnp.int32, (L, L), 1)
    causal = col > row                              # [L, L]
    pad_all = pad_ref[...]                          # [Bb, 1, L] (1.0 == key pad)

    scale = jnp.float32(10.0 / math.sqrt(d_k))
    neg = jnp.float32(-1000000000.0)

    ctx_rows = []
    for b in range(Bb):                             # static small batch block
        qb = q[b * L:(b + 1) * L].reshape(L, H, d_k).transpose(1, 0, 2)  # [H,L,dk]
        kb = k[b * L:(b + 1) * L].reshape(L, H, d_k).transpose(1, 0, 2)
        vb = v[b * L:(b + 1) * L].reshape(L, H, d_v).transpose(1, 0, 2)  # [H,L,dv]

        masked = jnp.logical_or(causal, pad_all[b] > 0.0)                # [L, L]

        # 10x-scaled, masked softmax attention; all heads batched.
        # NOTE: the contraction K = d_k underfills the MXU; acceptable since
        # attention FLOPs are small vs the projections/FFN at these sizes.
        s = scale * jnp.einsum('hld,hmd->hlm', qb.astype(mm), kb.astype(mm),
                               preferred_element_type=jnp.float32)       # [H,L,L]
        s = jnp.where(masked[None, :, :], neg, s)
        m = jnp.max(s, axis=-1, keepdims=True)
        e = jnp.exp(s - m)
        a = e / jnp.sum(e, axis=-1, keepdims=True)  # exact softmax (parity)

        # Lane-denser store: last dim L*L instead of L.
        attn_ref[0, b] = a.reshape(H, L * L)

        ctx = jnp.einsum('hlm,hmd->hld', a.astype(mm), vb.astype(mm),
                         preferred_element_type=jnp.float32)             # [H,L,dv]
        ctx_rows.append(ctx.transpose(1, 0, 2).reshape(L, H * d_v))      # [L,H*dv]

    ctx_all = ctx_rows[0] if Bb == 1 else jnp.concatenate(ctx_rows, axis=0)

    # --- output projection (K = H*d_v), residual + LayerNorm ---
    attn_out = jnp.dot(ctx_all.astype(mm), wfc_ref[0].astype(mm),
                       preferred_element_type=jnp.float32)               # [Bb*L, D]
    h1 = _layer_norm(attn_out + x, ln1g_ref[0], ln1b_ref[0])

    # --- position-wise FFN: Linear -> ReLU -> Linear, residual + LayerNorm ---
    ff = jnp.dot(h1.astype(mm), w1_ref[0].astype(mm),
                 preferred_element_type=jnp.float32)                     # [Bb*L, d_ff]
    ff = jnp.maximum(ff, 0.0)
    ff = jnp.dot(ff.astype(mm), w2_ref[0].astype(mm),
                 preferred_element_type=jnp.float32)                     # [Bb*L, D]
    h2 = _layer_norm(ff + h1, ln2g_ref[0], ln2b_ref[0])

    out_ref[...] = h2.reshape(Bb, L, D)


# ----------------------------------------------------------------------------
# Per-generation VMEM budget
# ----------------------------------------------------------------------------
def _pick_vmem_limit_bytes():
    """Leave headroom under physical VMEM (64 MiB on v7x, 128 MiB v5e/v6e)."""
    try:
        info = pltpu.get_tpu_info()
        cap = getattr(info, "vmem_capacity_bytes", None)
        if cap:
            return int(max(32 << 20, min(int(cap) - (16 << 20), 110 << 20)))
    except Exception:
        pass
    return 64 << 20


# ----------------------------------------------------------------------------
# Wrapper: one pallas_call for the whole decoder stack
# ----------------------------------------------------------------------------
def decoder_forward(hidden, token_ids, params, *, n_heads, d_k, d_v,
                    batch_block=None, use_bf16=True):
    """Replicates Decoder.forward (stack of DecoderLayers) in one kernel.

    hidden:    [B, L, D] float32
    token_ids: [B, L]    int32 (0 == pad), used to build the attention mask
    params:    dict of layer-stacked weights (leading dim = n_layers)
    Returns (hidden_out [B,L,D], [attn_l0, attn_l1, ...] each [B,H,L,L]).
    """
    B, L, D = hidden.shape
    H = n_heads
    n_layers = params["wq"].shape[0]
    d_ff = params["w1"].shape[-1]
    Bb = B if batch_block is None else batch_block
    assert B % Bb == 0, "batch_block must divide batch size"

    # thin pad vector instead of a [B, L, L] mask (mask rebuilt in-kernel)
    pad_f = (token_ids == 0).astype(jnp.float32).reshape(B, 1, L)

    kernel = functools.partial(decoder_kernel, n_heads=H, d_k=d_k, d_v=d_v,
                               use_bf16=use_bf16)

    def bspec(shape):   # batch-blocked, layer-invariant inputs
        nd = len(shape)
        return pl.BlockSpec((Bb,) + tuple(shape[1:]),
                            lambda i, l, _nd=nd: (i,) + (0,) * (_nd - 1))

    def lspec(shape):   # layer-stacked weights
        nd = len(shape)
        return pl.BlockSpec((1,) + tuple(shape[1:]),
                            lambda i, l, _nd=nd: (l,) + (0,) * (_nd - 1))

    in_specs = [
        bspec((B, 1, L)),                          # pad vector
        bspec((B, L, D)),                          # hidden state (read at layer 0)
        lspec((n_layers, D, H * d_k)),             # Wq
        lspec((n_layers, D, H * d_k)),             # Wk
        lspec((n_layers, D, H * d_v)),             # Wv
        lspec((n_layers, H * d_v, D)),             # Wfc
        lspec((n_layers, 1, D)),                   # ln1 gamma
        lspec((n_layers, 1, D)),                   # ln1 beta
        lspec((n_layers, D, d_ff)),                # W1
        lspec((n_layers, d_ff, D)),                # W2
        lspec((n_layers, 1, D)),                   # ln2 gamma
        lspec((n_layers, 1, D)),                   # ln2 beta
    ]
    out_specs = [
        pl.BlockSpec((Bb, L, D), lambda i, l: (i, 0, 0)),        # resident over l
        pl.BlockSpec((1, Bb, H, L * L), lambda i, l: (l, i, 0, 0)),
    ]
    out_shape = (
        jax.ShapeDtypeStruct((B, L, D), jnp.float32),
        jax.ShapeDtypeStruct((n_layers, B, H, L * L), jnp.float32),
    )

    out_hidden, attn_flat = pl.pallas_call(
        kernel,
        out_shape=out_shape,
        grid_spec=pltpu.PrefetchScalarGridSpec(
            num_scalar_prefetch=0,
            grid=(B // Bb, n_layers),              # batch blocks outer, layers inner
            in_specs=in_specs,
            out_specs=out_specs,
        ),
        compiler_params=pltpu.CompilerParams(
            dimension_semantics=("parallel", "arbitrary"),
            vmem_limit_bytes=_pick_vmem_limit_bytes(),
        ),
    )(pad_f, hidden,
      params["wq"], params["wk"], params["wv"], params["wfc"],
      params["ln1g"], params["ln1b"],
      params["w1"], params["w2"],
      params["ln2g"], params["ln2b"])

    dec_self_attns = [attn_flat[i].reshape(B, H, L, L) for i in range(n_layers)]
    return out_hidden, dec_self_attns


# ----------------------------------------------------------------------------
# Deterministic parameter init (stacked across layers)
# ----------------------------------------------------------------------------
def init_params(key, n_layers, d_model, n_heads, d_k, d_v, d_ff):
    layers = []
    for i in range(n_layers):
        ks = jax.random.split(jax.random.fold_in(key, i), 6)
        layers.append(dict(
            wq=0.02 * jax.random.normal(ks[0], (d_model, n_heads * d_k), jnp.float32),
            wk=0.02 * jax.random.normal(ks[1], (d_model, n_heads * d_k), jnp.float32),
            wv=0.02 * jax.random.normal(ks[2], (d_model, n_heads * d_v), jnp.float32),
            wfc=0.02 * jax.random.normal(ks[3], (n_heads * d_v, d_model), jnp.float32),
            ln1g=jnp.ones((1, d_model), jnp.float32),
            ln1b=jnp.zeros((1, d_model), jnp.float32),
            w1=0.02 * jax.random.normal(ks[4], (d_model, d_ff), jnp.float32),
            w2=0.02 * jax.random.normal(ks[5], (d_ff, d_model), jnp.float32),
            ln2g=jnp.ones((1, d_model), jnp.float32),
            ln2b=jnp.zeros((1, d_model), jnp.float32),
        ))
    return {k: jnp.stack([lp[k] for lp in layers], axis=0) for k in layers[0]}


# ----------------------------------------------------------------------------
if __name__ == "__main__":
    # Small configuration consistent with the module's forward pass.
    B, L = 2, 8            # batch, tgt_len
    D = 32                 # d_model
    H, DK, DV = 4, 8, 8    # n_heads, d_k, d_v
    DFF = 64               # d_feedforward
    N_LAYERS = 2

    key = jax.random.PRNGKey(0)
    k_tok, k_hid, k_par = jax.random.split(key, 3)

    # token ids (0 == pad) used only to build the attention mask (in-kernel)
    token_ids = jax.random.randint(k_tok, (B, L), 0, 6, dtype=jnp.int32)
    # continuous hidden state fed to the decoder layers: [B, L, D]
    hidden = jax.random.normal(k_hid, (B, L, D), jnp.float32)

    params = init_params(k_par, N_LAYERS, D, H, DK, DV, DFF)

    out_hidden, attns = decoder_forward(hidden, token_ids, params,
                                        n_heads=H, d_k=DK, d_v=DV,
                                        batch_block=B, use_bf16=True)
    out_hidden = jax.block_until_ready(out_hidden)
    attns = [jax.block_until_ready(a) for a in attns]

    assert out_hidden.shape == (B, L, D)
    assert all(a.shape == (B, H, L, L) for a in attns)
    assert bool(jnp.all(jnp.isfinite(out_hidden)))
    assert all(bool(jnp.all(jnp.isfinite(a))) for a in attns)
    print("KERNEL_OK")
</pallas_src>

<mosaic_0001>
module attributes {stable_mosaic.version = 11 : i64} {
  func.func @decoder_kernel(%arg0: i32, %arg1: i32, %arg2: memref<2x1x8xf32, #tpu.memory_space<vmem>>, %arg3: memref<2x8x32xf32, #tpu.memory_space<vmem>>, %arg4: memref<1x32x32xf32, #tpu.memory_space<vmem>>, %arg5: memref<1x32x32xf32, #tpu.memory_space<vmem>>, %arg6: memref<1x32x32xf32, #tpu.memory_space<vmem>>, %arg7: memref<1x32x32xf32, #tpu.memory_space<vmem>>, %arg8: memref<1x1x32xf32, #tpu.memory_space<vmem>>, %arg9: memref<1x1x32xf32, #tpu.memory_space<vmem>>, %arg10: memref<1x32x64xf32, #tpu.memory_space<vmem>>, %arg11: memref<1x64x32xf32, #tpu.memory_space<vmem>>, %arg12: memref<1x1x32xf32, #tpu.memory_space<vmem>>, %arg13: memref<1x1x32xf32, #tpu.memory_space<vmem>>, %arg14: memref<2x8x32xf32, #tpu.memory_space<vmem>>, %arg15: memref<1x2x4x64xf32, #tpu.memory_space<vmem>>) attributes {dimension_semantics = [#tpu.dimension_semantics<parallel>, #tpu.dimension_semantics<arbitrary>], iteration_bounds = array<i64: 1, 2>, scalar_prefetch = 0 : i64, scratch_operands = 0 : i64, tpu.core_type = #tpu.core_type<tc>, window_params = [{transform_indices = @transform_0, window_bounds = array<i64: 2, 1, 8>}, {transform_indices = @transform_1, window_bounds = array<i64: 2, 8, 32>}, {transform_indices = @transform_2, window_bounds = array<i64: 1, 32, 32>}, {transform_indices = @transform_3, window_bounds = array<i64: 1, 32, 32>}, {transform_indices = @transform_4, window_bounds = array<i64: 1, 32, 32>}, {transform_indices = @transform_5, window_bounds = array<i64: 1, 32, 32>}, {transform_indices = @transform_6, window_bounds = array<i64: 1, 1, 32>}, {transform_indices = @transform_7, window_bounds = array<i64: 1, 1, 32>}, {transform_indices = @transform_8, window_bounds = array<i64: 1, 32, 64>}, {transform_indices = @transform_9, window_bounds = array<i64: 1, 64, 32>}, {transform_indices = @transform_10, window_bounds = array<i64: 1, 1, 32>}, {transform_indices = @transform_11, window_bounds = array<i64: 1, 1, 32>}, {transform_indices = @transform_12, window_bounds = array<i64: 2, 8, 32>}, {transform_indices = @transform_13, window_bounds = array<i64: 1, 2, 4, 64>}]} {
    %c0_i32 = arith.constant 0 : i32
    %0 = arith.cmpi eq, %arg1, %c0_i32 : i32
    %1 = arith.extui %0 : i1 to i32
    %c0_i32_0 = arith.constant 0 : i32
    %2 = arith.cmpi ne, %1, %c0_i32_0 : i32
    scf.if %2 {
      %c0_76 = arith.constant 0 : index
      %c0_77 = arith.constant 0 : index
      %c0_78 = arith.constant 0 : index
      %178 = vector.load %arg3[%c0_76, %c0_77, %c0_78] : memref<2x8x32xf32, #tpu.memory_space<vmem>>, vector<2x8x32xf32>
      %c0_79 = arith.constant 0 : index
      %c0_80 = arith.constant 0 : index
      %c0_81 = arith.constant 0 : index
      %179 = vector.load %arg14[%c0_79, %c0_80, %c0_81] : memref<2x8x32xf32, #tpu.memory_space<vmem>>, vector<2x8x32xf32>
      tpu.vector_store %arg14[%c0_79, %c0_80, %c0_81], %178 {strides = array<i32>} : memref<2x8x32xf32, #tpu.memory_space<vmem>>, vector<2x8x32xf32>,
    } else {
    }
    %c0 = arith.constant 0 : index
    %c0_1 = arith.constant 0 : index
    %c0_2 = arith.constant 0 : index
    %3 = vector.load %arg14[%c0, %c0_1, %c0_2] : memref<2x8x32xf32, #tpu.memory_space<vmem>>, vector<2x8x32xf32>
    %4 = vector.shape_cast %3 : vector<2x8x32xf32> to vector<16x32xf32>
    %5 = arith.truncf %4 : vector<16x32xf32> to vector<16x32xbf16>
    %c0_3 = arith.constant 0 : index
    %c0_4 = arith.constant 0 : index
    %c0_5 = arith.constant 0 : index
    %6 = vector.load %arg4[%c0_3, %c0_4, %c0_5] : memref<1x32x32xf32, #tpu.memory_space<vmem>>, vector<1x32x32xf32>
    %7 = vector.shape_cast %6 : vector<1x32x32xf32> to vector<32x32xf32>
    %8 = arith.truncf %7 : vector<32x32xf32> to vector<32x32xbf16>
    %cst = arith.constant dense<0.000000e+00> : vector<16x32xf32>
    %9 = tpu.matmul %5, %8, %cst {dimension_numbers = #tpu.dot_dimension_numbers<[1], [0], [0], [1], [0, 0, 1, 1], [], []>} : vector<16x32xbf16>, vector<32x32xbf16>, vector<16x32xf32> -> vector<16x32xf32>
    %c0_6 = arith.constant 0 : index
    %c0_7 = arith.constant 0 : index
    %c0_8 = arith.constant 0 : index
    %10 = vector.load %arg5[%c0_6, %c0_7, %c0_8] : memref<1x32x32xf32, #tpu.memory_space<vmem>>, vector<1x32x32xf32>
    %11 = vector.shape_cast %10 : vector<1x32x32xf32> to vector<32x32xf32>
    %12 = arith.truncf %11 : vector<32x32xf32> to vector<32x32xbf16>
    %cst_9 = arith.constant dense<0.000000e+00> : vector<16x32xf32>
    %13 = tpu.matmul %5, %12, %cst_9 {dimension_numbers = #tpu.dot_dimension_numbers<[1], [0], [0], [1], [0, 0, 1, 1], [], []>} : vector<16x32xbf16>, vector<32x32xbf16>, vector<16x32xf32> -> vector<16x32xf32>
    %c0_10 = arith.constant 0 : index
    %c0_11 = arith.constant 0 : index
    %c0_12 = arith.constant 0 : index
    %14 = vector.load %arg6[%c0_10, %c0_11, %c0_12] : memref<1x32x32xf32, #tpu.memory_space<vmem>>, vector<1x32x32xf32>
    %15 = vector.shape_cast %14 : vector<1x32x32xf32> to vector<32x32xf32>
    %16 = arith.truncf %15 : vector<32x32xf32> to vector<32x32xbf16>
    %cst_13 = arith.constant dense<0.000000e+00> : vector<16x32xf32>
    %17 = tpu.matmul %5, %16, %cst_13 {dimension_numbers = #tpu.dot_dimension_numbers<[1], [0], [0], [1], [0, 0, 1, 1], [], []>} : vector<16x32xbf16>, vector<32x32xbf16>, vector<16x32xf32> -> vector<16x32xf32>
    %18 = tpu.iota {dimensions = array<i32: 0>} : vector<8x8xi32>
    %19 = tpu.iota {dimensions = array<i32: 1>} : vector<8x8xi32>
    %20 = arith.cmpi sgt, %19, %18 : vector<8x8xi32>
    %c0_14 = arith.constant 0 : index
    %c0_15 = arith.constant 0 : index
    %c0_16 = arith.constant 0 : index
    %21 = vector.load %arg2[%c0_14, %c0_15, %c0_16] : memref<2x1x8xf32, #tpu.memory_space<vmem>>, vector<2x1x8xf32>
    %22 = vector.extract_strided_slice %9 {offsets = [0, 0], sizes = [8, 32], strides = [1, 1]} : vector<16x32xf32> to vector<8x32xf32>
    %23 = vector.shape_cast %22 : vector<8x32xf32> to vector<8x4x8xf32>
    %24 = tpu.transpose %23, [1, 0, 2] : vector<8x4x8xf32> -> vector<4x8x8xf32>
    %25 = vector.extract_strided_slice %13 {offsets = [0, 0], sizes = [8, 32], strides = [1, 1]} : vector<16x32xf32> to vector<8x32xf32>
    %26 = vector.shape_cast %25 : vector<8x32xf32> to vector<8x4x8xf32>
    %27 = tpu.transpose %26, [1, 0, 2] : vector<8x4x8xf32> -> vector<4x8x8xf32>
    %28 = vector.extract_strided_slice %17 {offsets = [0, 0], sizes = [8, 32], strides = [1, 1]} : vector<16x32xf32> to vector<8x32xf32>
    %29 = vector.shape_cast %28 : vector<8x32xf32> to vector<8x4x8xf32>
    %30 = tpu.transpose %29, [1, 0, 2] : vector<8x4x8xf32> -> vector<4x8x8xf32>
    %31 = vector.extract_strided_slice %21 {offsets = [0, 0, 0], sizes = [1, 1, 8], strides = [1, 1, 1]} : vector<2x1x8xf32> to vector<1x1x8xf32>
    %32 = vector.shape_cast %31 : vector<1x1x8xf32> to vector<1x8xf32>
    %cst_17 = arith.constant 0.000000e+00 : f32
    %33 = vector.broadcast %cst_17 : f32 to vector<1x8xf32>
    %34 = arith.cmpf ogt, %32, %33 : vector<1x8xf32>
    %35 = vector.broadcast %34 : vector<1x8xi1> to vector<8x8xi1>
    %36 = arith.ori %20, %35 : vector<8x8xi1>
    %37 = arith.truncf %24 : vector<4x8x8xf32> to vector<4x8x8xbf16>
    %38 = arith.truncf %27 : vector<4x8x8xf32> to vector<4x8x8xbf16>
    "tpu.trace_start"() <{level = 10 : i32, message = "hld,hmd->hlm"}> : () -> ()
    %cst_18 = arith.constant dense<0.000000e+00> : vector<4x8x8xf32>
    %39 = tpu.matmul %37, %38, %cst_18 {dimension_numbers = #tpu.dot_dimension_numbers<[2], [2], [1], [1], [0, 0, 0, 1, 1, 1], [0], [0]>} : vector<4x8x8xbf16>, vector<4x8x8xbf16>, vector<4x8x8xf32> -> vector<4x8x8xf32>
    "tpu.trace_stop"() : () -> ()
    %cst_19 = arith.constant 3.53553391 : f32
    %40 = vector.broadcast %cst_19 : f32 to vector<4x8x8xf32>
    %41 = arith.mulf %40, %39 : vector<4x8x8xf32>
    %42 = vector.shape_cast %36 : vector<8x8xi1> to vector<1x8x8xi1>
    %cst_20 = arith.constant -1.000000e+09 : f32
    %43 = vector.shape_cast %42 : vector<1x8x8xi1> to vector<1x8x8xi1>
    %44 = vector.broadcast %43 : vector<1x8x8xi1> to vector<4x8x8xi1>
    %45 = vector.broadcast %cst_20 : f32 to vector<4x8x8xf32>
    %46 = arith.select %44, %45, %41 : vector<4x8x8xi1>, vector<4x8x8xf32>
    %cst_21 = arith.constant dense<0xFF800000> : vector<4x8xf32>
    %47 = vector.multi_reduction <maximumf>, %46, %cst_21 [2] : vector<4x8x8xf32> to vector<4x8xf32>
    %48 = vector.shape_cast %47 : vector<4x8xf32> to vector<4x8x1xf32>
    %49 = vector.broadcast %48 : vector<4x8x1xf32> to vector<4x8x8xf32>
    %50 = arith.subf %46, %49 : vector<4x8x8xf32>
    %51 = math.exp %50 : vector<4x8x8xf32>
    %cst_22 = arith.constant dense<0.000000e+00> : vector<4x8xf32>
    %52 = vector.multi_reduction <add>, %51, %cst_22 [2] : vector<4x8x8xf32> to vector<4x8xf32>
    %53 = vector.shape_cast %52 : vector<4x8xf32> to vector<4x8x1xf32>
    %54 = vector.broadcast %53 : vector<4x8x1xf32> to vector<4x8x8xf32>
    %55 = arith.divf %51, %54 : vector<4x8x8xf32>
    %56 = vector.shape_cast %55 : vector<4x8x8xf32> to vector<4x64xf32>
    %c0_23 = arith.constant 0 : index
    %c0_24 = arith.constant 0 : index
    %c0_25 = arith.constant 0 : index
    %c0_26 = arith.constant 0 : index
    %57 = vector.load %arg15[%c0_23, %c0_24, %c0_25, %c0_26] : memref<1x2x4x64xf32, #tpu.memory_space<vmem>>, vector<1x1x4x64xf32>
    %58 = vector.shape_cast %57 : vector<1x1x4x64xf32> to vector<4x64xf32>
    %59 = vector.shape_cast %56 : vector<4x64xf32> to vector<1x1x4x64xf32>
    tpu.vector_store %arg15[%c0_23, %c0_24, %c0_25, %c0_26], %59 {strides = array<i32>} : memref<1x2x4x64xf32, #tpu.memory_space<vmem>>, vector<1x1x4x64xf32>,
    %60 = arith.truncf %55 : vector<4x8x8xf32> to vector<4x8x8xbf16>
    %61 = arith.truncf %30 : vector<4x8x8xf32> to vector<4x8x8xbf16>
    "tpu.trace_start"() <{level = 10 : i32, message = "hlm,hmd->hld"}> : () -> ()
    %cst_27 = arith.constant dense<0.000000e+00> : vector<4x8x8xf32>
    %62 = tpu.matmul %60, %61, %cst_27 {dimension_numbers = #tpu.dot_dimension_numbers<[2], [1], [1], [2], [0, 0, 0, 1, 1, 2], [0], [0]>} : vector<4x8x8xbf16>, vector<4x8x8xbf16>, vector<4x8x8xf32> -> vector<4x8x8xf32>
    "tpu.trace_stop"() : () -> ()
    %63 = tpu.transpose %62, [1, 0, 2] : vector<4x8x8xf32> -> vector<8x4x8xf32>
    %64 = vector.shape_cast %63 : vector<8x4x8xf32> to vector<8x32xf32>
    %65 = vector.extract_strided_slice %9 {offsets = [8, 0], sizes = [8, 32], strides = [1, 1]} : vector<16x32xf32> to vector<8x32xf32>
    %66 = vector.shape_cast %65 : vector<8x32xf32> to vector<8x4x8xf32>
    %67 = tpu.transpose %66, [1, 0, 2] : vector<8x4x8xf32> -> vector<4x8x8xf32>
    %68 = vector.extract_strided_slice %13 {offsets = [8, 0], sizes = [8, 32], strides = [1, 1]} : vector<16x32xf32> to vector<8x32xf32>
    %69 = vector.shape_cast %68 : vector<8x32xf32> to vector<8x4x8xf32>
    %70 = tpu.transpose %69, [1, 0, 2] : vector<8x4x8xf32> -> vector<4x8x8xf32>
    %71 = vector.extract_strided_slice %17 {offsets = [8, 0], sizes = [8, 32], strides = [1, 1]} : vector<16x32xf32> to vector<8x32xf32>
    %72 = vector.shape_cast %71 : vector<8x32xf32> to vector<8x4x8xf32>
    %73 = tpu.transpose %72, [1, 0, 2] : vector<8x4x8xf32> -> vector<4x8x8xf32>
    %74 = vector.extract_strided_slice %21 {offsets = [1, 0, 0], sizes = [1, 1, 8], strides = [1, 1, 1]} : vector<2x1x8xf32> to vector<1x1x8xf32>
    %75 = vector.shape_cast %74 : vector<1x1x8xf32> to vector<1x8xf32>
    %cst_28 = arith.constant 0.000000e+00 : f32
    %76 = vector.broadcast %cst_28 : f32 to vector<1x8xf32>
    %77 = arith.cmpf ogt, %75, %76 : vector<1x8xf32>
    %78 = vector.broadcast %77 : vector<1x8xi1> to vector<8x8xi1>
    %79 = arith.ori %20, %78 : vector<8x8xi1>
    %80 = arith.truncf %67 : vector<4x8x8xf32> to vector<4x8x8xbf16>
    %81 = arith.truncf %70 : vector<4x8x8xf32> to vector<4x8x8xbf16>
    "tpu.trace_start"() <{level = 10 : i32, message = "hld,hmd->hlm"}> : () -> ()
    %cst_29 = arith.constant dense<0.000000e+00> : vector<4x8x8xf32>
    %82 = tpu.matmul %80, %81, %cst_29 {dimension_numbers = #tpu.dot_dimension_numbers<[2], [2], [1], [1], [0, 0, 0, 1, 1, 1], [0], [0]>} : vector<4x8x8xbf16>, vector<4x8x8xbf16>, vector<4x8x8xf32> -> vector<4x8x8xf32>
    "tpu.trace_stop"() : () -> ()
    %cst_30 = arith.constant 3.53553391 : f32
    %83 = vector.broadcast %cst_30 : f32 to vector<4x8x8xf32>
    %84 = arith.mulf %83, %82 : vector<4x8x8xf32>
    %85 = vector.shape_cast %79 : vector<8x8xi1> to vector<1x8x8xi1>
    %cst_31 = arith.constant -1.000000e+09 : f32
    %86 = vector.shape_cast %85 : vector<1x8x8xi1> to vector<1x8x8xi1>
    %87 = vector.broadcast %86 : vector<1x8x8xi1> to vector<4x8x8xi1>
    %88 = vector.broadcast %cst_31 : f32 to vector<4x8x8xf32>
    %89 = arith.select %87, %88, %84 : vector<4x8x8xi1>, vector<4x8x8xf32>
    %cst_32 = arith.constant dense<0xFF800000> : vector<4x8xf32>
    %90 = vector.multi_reduction <maximumf>, %89, %cst_32 [2] : vector<4x8x8xf32> to vector<4x8xf32>
    %91 = vector.shape_cast %90 : vector<4x8xf32> to vector<4x8x1xf32>
    %92 = vector.broadcast %91 : vector<4x8x1xf32> to vector<4x8x8xf32>
    %93 = arith.subf %89, %92 : vector<4x8x8xf32>
    %94 = math.exp %93 : vector<4x8x8xf32>
    %cst_33 = arith.constant dense<0.000000e+00> : vector<4x8xf32>
    %95 = vector.multi_reduction <add>, %94, %cst_33 [2] : vector<4x8x8xf32> to vector<4x8xf32>
    %96 = vector.shape_cast %95 : vector<4x8xf32> to vector<4x8x1xf32>
    %97 = vector.broadcast %96 : vector<4x8x1xf32> to vector<4x8x8xf32>
    %98 = arith.divf %94, %97 : vector<4x8x8xf32>
    %99 = vector.shape_cast %98 : vector<4x8x8xf32> to vector<4x64xf32>
    %c0_34 = arith.constant 0 : index
    %c1 = arith.constant 1 : index
    %c0_35 = arith.constant 0 : index
    %c0_36 = arith.constant 0 : index
    %100 = vector.load %arg15[%c0_34, %c1, %c0_35, %c0_36] : memref<1x2x4x64xf32, #tpu.memory_space<vmem>>, vector<1x1x4x64xf32>
    %101 = vector.shape_cast %100 : vector<1x1x4x64xf32> to vector<4x64xf32>
    %102 = vector.shape_cast %99 : vector<4x64xf32> to vector<1x1x4x64xf32>
    tpu.vector_store %arg15[%c0_34, %c1, %c0_35, %c0_36], %102 {strides = array<i32>} : memref<1x2x4x64xf32, #tpu.memory_space<vmem>>, vector<1x1x4x64xf32>,
    %103 = arith.truncf %98 : vector<4x8x8xf32> to vector<4x8x8xbf16>
    %104 = arith.truncf %73 : vector<4x8x8xf32> to vector<4x8x8xbf16>
    "tpu.trace_start"() <{level = 10 : i32, message = "hlm,hmd->hld"}> : () -> ()
    %cst_37 = arith.constant dense<0.000000e+00> : vector<4x8x8xf32>
    %105 = tpu.matmul %103, %104, %cst_37 {dimension_numbers = #tpu.dot_dimension_numbers<[2], [1], [1], [2], [0, 0, 0, 1, 1, 2], [0], [0]>} : vector<4x8x8xbf16>, vector<4x8x8xbf16>, vector<4x8x8xf32> -> vector<4x8x8xf32>
    "tpu.trace_stop"() : () -> ()
    %106 = tpu.transpose %105, [1, 0, 2] : vector<4x8x8xf32> -> vector<8x4x8xf32>
    %107 = vector.shape_cast %106 : vector<8x4x8xf32> to vector<8x32xf32>
    %108 = tpu.concatenate %64, %107 in 0 : vector<8x32xf32>, vector<8x32xf32> -> vector<16x32xf32>
    %109 = arith.truncf %108 : vector<16x32xf32> to vector<16x32xbf16>
    %c0_38 = arith.constant 0 : index
    %c0_39 = arith.constant 0 : index
    %c0_40 = arith.constant 0 : index
    %110 = vector.load %arg7[%c0_38, %c0_39, %c0_40] : memref<1x32x32xf32, #tpu.memory_space<vmem>>, vector<1x32x32xf32>
    %111 = vector.shape_cast %110 : vector<1x32x32xf32> to vector<32x32xf32>
    %112 = arith.truncf %111 : vector<32x32xf32> to vector<32x32xbf16>
    %cst_41 = arith.constant dense<0.000000e+00> : vector<16x32xf32>
    %113 = tpu.matmul %109, %112, %cst_41 {dimension_numbers = #tpu.dot_dimension_numbers<[1], [0], [0], [1], [0, 0, 1, 1], [], []>} : vector<16x32xbf16>, vector<32x32xbf16>, vector<16x32xf32> -> vector<16x32xf32>
    %114 = arith.addf %113, %4 : vector<16x32xf32>
    %c0_42 = arith.constant 0 : index
    %c0_43 = arith.constant 0 : index
    %c0_44 = arith.constant 0 : index
    %115 = vector.load %arg8[%c0_42, %c0_43, %c0_44] : memref<1x1x32xf32, #tpu.memory_space<vmem>>, vector<1x1x32xf32>
    %116 = vector.shape_cast %115 : vector<1x1x32xf32> to vector<1x32xf32>
    %c0_45 = arith.constant 0 : index
    %c0_46 = arith.constant 0 : index
    %c0_47 = arith.constant 0 : index
    %117 = vector.load %arg9[%c0_45, %c0_46, %c0_47] : memref<1x1x32xf32, #tpu.memory_space<vmem>>, vector<1x1x32xf32>
    %118 = vector.shape_cast %117 : vector<1x1x32xf32> to vector<1x32xf32>
    %cst_48 = arith.constant dense<0.000000e+00> : vector<16xf32>
    %119 = vector.multi_reduction <add>, %114, %cst_48 [1] : vector<16x32xf32> to vector<16xf32>
    %120 = vector.shape_cast %119 : vector<16xf32> to vector<16x1xf32>
    %cst_49 = arith.constant 3.200000e+01 : f32
    %121 = vector.broadcast %cst_49 : f32 to vector<16x1xf32>
    %122 = arith.divf %120, %121 : vector<16x1xf32>
    %123 = vector.broadcast %122 : vector<16x1xf32> to vector<16x32xf32>
    %124 = arith.subf %114, %123 : vector<16x32xf32>
    %125 = arith.mulf %124, %124 : vector<16x32xf32>
    %cst_50 = arith.constant dense<0.000000e+00> : vector<16xf32>
    %126 = vector.multi_reduction <add>, %125, %cst_50 [1] : vector<16x32xf32> to vector<16xf32>
    %127 = vector.shape_cast %126 : vector<16xf32> to vector<16x1xf32>
    %cst_51 = arith.constant 3.200000e+01 : f32
    %128 = vector.broadcast %cst_51 : f32 to vector<16x1xf32>
    %129 = arith.divf %127, %128 : vector<16x1xf32>
    %cst_52 = arith.constant 9.99999974E-6 : f32
    %130 = vector.broadcast %cst_52 : f32 to vector<16x1xf32>
    %131 = arith.addf %129, %130 : vector<16x1xf32>
    %132 = math.rsqrt %131 : vector<16x1xf32>
    %133 = vector.broadcast %132 : vector<16x1xf32> to vector<16x32xf32>
    %134 = arith.mulf %124, %133 : vector<16x32xf32>
    %135 = vector.broadcast %116 : vector<1x32xf32> to vector<16x32xf32>
    %136 = arith.mulf %134, %135 : vector<16x32xf32>
    %137 = vector.broadcast %118 : vector<1x32xf32> to vector<16x32xf32>
    %138 = arith.addf %136, %137 : vector<16x32xf32>
    %139 = arith.truncf %138 : vector<16x32xf32> to vector<16x32xbf16>
    %c0_53 = arith.constant 0 : index
    %c0_54 = arith.constant 0 : index
    %c0_55 = arith.constant 0 : index
    %140 = vector.load %arg10[%c0_53, %c0_54, %c0_55] : memref<1x32x64xf32, #tpu.memory_space<vmem>>, vector<1x32x64xf32>
    %141 = vector.shape_cast %140 : vector<1x32x64xf32> to vector<32x64xf32>
    %142 = arith.truncf %141 : vector<32x64xf32> to vector<32x64xbf16>
    %cst_56 = arith.constant dense<0.000000e+00> : vector<16x64xf32>
    %143 = tpu.matmul %139, %142, %cst_56 {dimension_numbers = #tpu.dot_dimension_numbers<[1], [0], [0], [1], [0, 0, 1, 1], [], []>} : vector<16x32xbf16>, vector<32x64xbf16>, vector<16x64xf32> -> vector<16x64xf32>
    %cst_57 = arith.constant 0.000000e+00 : f32
    %144 = vector.broadcast %cst_57 : f32 to vector<16x64xf32>
    %145 = arith.maximumf %143, %144 : vector<16x64xf32>
    %146 = arith.truncf %145 : vector<16x64xf32> to vector<16x64xbf16>
    %c0_58 = arith.constant 0 : index
    %c0_59 = arith.constant 0 : index
    %c0_60 = arith.constant 0 : index
    %147 = vector.load %arg11[%c0_58, %c0_59, %c0_60] : memref<1x64x32xf32, #tpu.memory_space<vmem>>, vector<1x64x32xf32>
    %148 = vector.shape_cast %147 : vector<1x64x32xf32> to vector<64x32xf32>
    %149 = arith.truncf %148 : vector<64x32xf32> to vector<64x32xbf16>
    %cst_61 = arith.constant dense<0.000000e+00> : vector<16x32xf32>
    %150 = tpu.matmul %146, %149, %cst_61 {dimension_numbers = #tpu.dot_dimension_numbers<[1], [0], [0], [1], [0, 0, 1, 1], [], []>} : vector<16x64xbf16>, vector<64x32xbf16>, vector<16x32xf32> -> vector<16x32xf32>
    %151 = arith.addf %150, %138 : vector<16x32xf32>
    %c0_62 = arith.constant 0 : index
    %c0_63 = arith.constant 0 : index
    %c0_64 = arith.constant 0 : index
    %152 = vector.load %arg12[%c0_62, %c0_63, %c0_64] : memref<1x1x32xf32, #tpu.memory_space<vmem>>, vector<1x1x32xf32>
    %153 = vector.shape_cast %152 : vector<1x1x32xf32> to vector<1x32xf32>
    %c0_65 = arith.constant 0 : index
    %c0_66 = arith.constant 0 : index
    %c0_67 = arith.constant 0 : index
    %154 = vector.load %arg13[%c0_65, %c0_66, %c0_67] : memref<1x1x32xf32, #tpu.memory_space<vmem>>, vector<1x1x32xf32>
    %155 = vector.shape_cast %154 : vector<1x1x32xf32> to vector<1x32xf32>
    %cst_68 = arith.constant dense<0.000000e+00> : vector<16xf32>
    %156 = vector.multi_reduction <add>, %151, %cst_68 [1] : vector<16x32xf32> to vector<16xf32>
    %157 = vector.shape_cast %156 : vector<16xf32> to vector<16x1xf32>
    %cst_69 = arith.constant 3.200000e+01 : f32
    %158 = vector.broadcast %cst_69 : f32 to vector<16x1xf32>
    %159 = arith.divf %157, %158 : vector<16x1xf32>
    %160 = vector.broadcast %159 : vector<16x1xf32> to vector<16x32xf32>
    %161 = arith.subf %151, %160 : vector<16x32xf32>
    %162 = arith.mulf %161, %161 : vector<16x32xf32>
    %cst_70 = arith.constant dense<0.000000e+00> : vector<16xf32>
    %163 = vector.multi_reduction <add>, %162, %cst_70 [1] : vector<16x32xf32> to vector<16xf32>
    %164 = vector.shape_cast %163 : vector<16xf32> to vector<16x1xf32>
    %cst_71 = arith.constant 3.200000e+01 : f32
    %165 = vector.broadcast %cst_71 : f32 to vector<16x1xf32>
    %166 = arith.divf %164, %165 : vector<16x1xf32>
    %cst_72 = arith.constant 9.99999974E-6 : f32
    %167 = vector.broadcast %cst_72 : f32 to vector<16x1xf32>
    %168 = arith.addf %166, %167 : vector<16x1xf32>
    %169 = math.rsqrt %168 : vector<16x1xf32>
    %170 = vector.broadcast %169 : vector<16x1xf32> to vector<16x32xf32>
    %171 = arith.mulf %161, %170 : vector<16x32xf32>
    %172 = vector.broadcast %153 : vector<1x32xf32> to vector<16x32xf32>
    %173 = arith.mulf %171, %172 : vector<16x32xf32>
    %174 = vector.broadcast %155 : vector<1x32xf32> to vector<16x32xf32>
    %175 = arith.addf %173, %174 : vector<16x32xf32>
    %176 = vector.shape_cast %175 : vector<16x32xf32> to vector<2x8x32xf32>
    %c0_73 = arith.constant 0 : index
    %c0_74 = arith.constant 0 : index
    %c0_75 = arith.constant 0 : index
    %177 = vector.load %arg14[%c0_73, %c0_74, %c0_75] : memref<2x8x32xf32, #tpu.memory_space<vmem>>, vector<2x8x32xf32>
    tpu.vector_store %arg14[%c0_73, %c0_74, %c0_75], %176 {strides = array<i32>} : memref<2x8x32xf32, #tpu.memory_space<vmem>>, vector<2x8x32xf32>,
    return
  }
  func.func @transform_0(%arg0: i32, %arg1: i32) -> (i32, i32, i32) {
    %c0_i32 = arith.constant 0 : i32
    %c0_i32_0 = arith.constant 0 : i32
    %c0_i32_1 = arith.constant 0 : i32
    return %arg0, %c0_i32, %c0_i32_0 : i32, i32, i32
  }
  func.func @transform_1(%arg0: i32, %arg1: i32) -> (i32, i32, i32) {
    %c0_i32 = arith.constant 0 : i32
    %c0_i32_0 = arith.constant 0 : i32
    %c0_i32_1 = arith.constant 0 : i32
    return %arg0, %c0_i32, %c0_i32_0 : i32, i32, i32
  }
  func.func @transform_2(%arg0: i32, %arg1: i32) -> (i32, i32, i32) {
    %c0_i32 = arith.constant 0 : i32
    %c0_i32_0 = arith.constant 0 : i32
    %c0_i32_1 = arith.constant 0 : i32
    return %arg1, %c0_i32, %c0_i32_0 : i32, i32, i32
  }
  func.func @transform_3(%arg0: i32, %arg1: i32) -> (i32, i32, i32) {
    %c0_i32 = arith.constant 0 : i32
    %c0_i32_0 = arith.constant 0 : i32
    %c0_i32_1 = arith.constant 0 : i32
    return %arg1, %c0_i32, %c0_i32_0 : i32, i32, i32
  }
  func.func @transform_4(%arg0: i32, %arg1: i32) -> (i32, i32, i32) {
    %c0_i32 = arith.constant 0 : i32
    %c0_i32_0 = arith.constant 0 : i32
    %c0_i32_1 = arith.constant 0 : i32
    return %arg1, %c0_i32, %c0_i32_0 : i32, i32, i32
  }
  func.func @transform_5(%arg0: i32, %arg1: i32) -> (i32, i32, i32) {
    %c0_i32 = arith.constant 0 : i32
    %c0_i32_0 = arith.constant 0 : i32
    %c0_i32_1 = arith.constant 0 : i32
    return %arg1, %c0_i32, %c0_i32_0 : i32, i32, i32
  }
  func.func @transform_6(%arg0: i32, %arg1: i32) -> (i32, i32, i32) {
    %c0_i32 = arith.constant 0 : i32
    %c0_i32_0 = arith.constant 0 : i32
    %c0_i32_1 = arith.constant 0 : i32
    return %arg1, %c0_i32, %c0_i32_0 : i32, i32, i32
  }
  func.func @transform_7(%arg0: i32, %arg1: i32) -> (i32, i32, i32) {
    %c0_i32 = arith.constant 0 : i32
    %c0_i32_0 = arith.constant 0 : i32
    %c0_i32_1 = arith.constant 0 : i32
    return %arg1, %c0_i32, %c0_i32_0 : i32, i32, i32
  }
  func.func @transform_8(%arg0: i32, %arg1: i32) -> (i32, i32, i32) {
    %c0_i32 = arith.constant 0 : i32
    %c0_i32_0 = arith.constant 0 : i32
    %c0_i32_1 = arith.constant 0 : i32
    return %arg1, %c0_i32, %c0_i32_0 : i32, i32, i32
  }
  func.func @transform_9(%arg0: i32, %arg1: i32) -> (i32, i32, i32) {
    %c0_i32 = arith.constant 0 : i32
    %c0_i32_0 = arith.constant 0 : i32
    %c0_i32_1 = arith.constant 0 : i32
    return %arg1, %c0_i32, %c0_i32_0 : i32, i32, i32
  }
  func.func @transform_10(%arg0: i32, %arg1: i32) -> (i32, i32, i32) {
    %c0_i32 = arith.constant 0 : i32
    %c0_i32_0 = arith.constant 0 : i32
    %c0_i32_1 = arith.constant 0 : i32
    return %arg1, %c0_i32, %c0_i32_0 : i32, i32, i32
  }
  func.func @transform_11(%arg0: i32, %arg1: i32) -> (i32, i32, i32) {
    %c0_i32 = arith.constant 0 : i32
    %c0_i32_0 = arith.constant 0 : i32
    %c0_i32_1 = arith.constant 0 : i32
    return %arg1, %c0_i32, %c0_i32_0 : i32, i32, i32
  }
  func.func @transform_12(%arg0: i32, %arg1: i32) -> (i32, i32, i32) {
    %c0_i32 = arith.constant 0 : i32
    %c0_i32_0 = arith.constant 0 : i32
    %c0_i32_1 = arith.constant 0 : i32
    return %arg0, %c0_i32, %c0_i32_0 : i32, i32, i32
  }
  func.func @transform_13(%arg0: i32, %arg1: i32) -> (i32, i32, i32, i32) {
    %c0_i32 = arith.constant 0 : i32
    %c0_i32_0 = arith.constant 0 : i32
    %c0_i32_1 = arith.constant 0 : i32
    return %arg1, %arg0, %c0_i32, %c0_i32_0 : i32, i32, i32, i32
  }
}

</mosaic_0001>

<bundles_post_ra>
// kernel: tpu_custom_call.1
= control target key start
LH: loop header
LB: loop body
LE: loop exit
PB: predicated region body
PF: predicated region fallthrough
CT: control target
= control target key end

     0   :  { %s4493_s0 = inlined_call_operand.hbm [shape: f32[2,1,8], index: 0, kind: input, shape index: {}]   ;;  %s4494_s1 = inlined_call_operand.hbm [shape: f32[2,8,32], index: 1, kind: input, shape index: {}]   ;;  %s4495_s2 = inlined_call_operand.vmem [shape: f32[2,32,32], index: 2, kind: input, shape index: {}]   ;;  %s4496_s3 = inlined_call_operand.vmem [shape: f32[2,32,32], index: 3, kind: input, shape index: {}]   ;;  %s4497_s4 = inlined_call_operand.vmem [shape: f32[2,32,32], index: 4, kind: input, shape index: {}]   ;;  %s4498_s5 = inlined_call_operand.hbm [shape: f32[2,32,32], index: 5, kind: input, shape index: {}]   ;;  %s4499_s6 = inlined_call_operand.vmem [shape: f32[2,1,32], index: 6, kind: input, shape index: {}]   ;;  %s4500_s7 = inlined_call_operand.vmem [shape: f32[2,1,32], index: 7, kind: input, shape index: {}]   ;;  %s4501_s8 = inlined_call_operand.hbm [shape: f32[2,32,64], index: 8, kind: input, shape index: {}]   ;;  %s4502_s9 = inlined_call_operand.vmem [shape: f32[2,64,32], index: 9, kind: input, shape index: {}]   ;;  %s4503_s10 = inlined_call_operand.vmem [shape: f32[2,1,32], index: 10, kind: input, shape index: {}]   ;;  %s4504_s11 = inlined_call_operand.vmem [shape: f32[2,1,32], index: 11, kind: input, shape index: {}]   ;;  %s4505_s12 = inlined_call_operand.hbm [shape: f32[2,8,32], index: 12, kind: output, shape index: {0}]   ;;  %s4506_s13 = inlined_call_operand.hbm [shape: f32[2,2,4,64], index: 13, kind: output, shape index: {1}]  }
   0x1   :  { %4519 = sst [smem:[#allocation26_spill]] %s4493_s0 }
   0x2   :  { %4520 = sst [smem:[#allocation27_spill]] %s4494_s1 }
   0x3   :  { %4521 = sst [smem:[#allocation28_spill]] %s4495_s2 }
   0x4   :  { %4522 = sst [smem:[#allocation29_spill]] %s4496_s3 }
   0x5   :  { %4523 = sst [smem:[#allocation30_spill]] %s4497_s4 }
   0x6   :  { %4524 = sst [smem:[#allocation31_spill]] %s4498_s5 }
   0x7   :  { %4525 = sst [smem:[#allocation32_spill]] %s4500_s7 }
   0x8   :  { %4526 = sst [smem:[#allocation33_spill]] %s4501_s8 }
   0x9   :  { %4527 = sst [smem:[#allocation34_spill]] %s4502_s9 }
   0xa   :  { %4528 = sst [smem:[#allocation35_spill]] %s4503_s10 }
   0xb   :  { %4529 = sst [smem:[#allocation36_spill]] %s4504_s11 }
   0xc   :  { %4530 = sst [smem:[#allocation37_spill]] %s4505_s12 }
   0xd   :  { %4531 = sst [smem:[#allocation38_spill]] %s4506_s13 }
   0xe   :  { %19 = vsyncpa [#allocation3], 0 }
   0xf   :  { %20 = vsyncpa [#allocation6], 0 }
  0x10   :  { %21 = vsyncpa [#allocation4], 0 }
  0x11   :  { %22 = vsyncpa [#allocation11], 0 }
  0x12   :  { %24 = vsyncpa [#allocation11 + $0x1], 0  ;;  %s3570_s25 = smov 0   ;;  %s3572_s26 = smov 0  }
  0x13   :  { %s3574_s27 = smov 0   ;;  %s3576_s28 = smov 0  }
  0x14   :  { %s3578_s29 = smov 0   ;;  %s3580_s30 = smov 0  }
  0x15 LB: > { %4532 = sst [smem:[#allocation17_spill]] %s3454_s25  ;;  %s3601_s14 = sadd.s32 4294967295, %s3474_s30   ;;  %s3474_s30 = sphi %s3580_s30, %s30_s30   ;;  %s3470_s29 = sphi %s3578_s29, %s4588_s29   ;;  %s3466_s28 = sphi %s3576_s28, %s4587_s28   ;;  %s3462_s27 = sphi %s3574_s27, %s4586_s27   ;;  %s3458_s26 = sphi %s3572_s26, %s4585_s26   ;;  %s3454_s25 = sphi %s3570_s25, %s4584_s25  }
  0x16   : > { %4533 = sst [smem:[#allocation18_spill]] %s3458_s26  ;;  %s2975_s15 = sadd.s32 4294967294, %s3474_s30  }
  0x17   : > { %4534 = sst [smem:[#allocation19_spill]] %s3462_s27  ;;  %p192_p0 = scmp.ne.s32.totalorder %s3458_s26, %s3454_s25 }
  0x18   : > { %4535 = sst [smem:[#allocation20_spill]] %s3470_s29  ;;  %p193_p1 = scmp.eq.s32.totalorder %s3601_s14, 0 }
  0x19   : > { %4536 = sst [smem:[#allocation21_spill]] %s3474_s30  ;;  %p400_p2 = scmp.eq.s32.totalorder %s3601_s14, 1 }
  0x1a   : > { %4537 = sst [smem:[#allocation22_spill]] %s3601_s14  ;;  %p406_p3 = scmp.eq.s32.totalorder %s2975_s15, 1 }
  0x1b   : > { %p3610_p4 = por %p193_p1, %p192_p0  ;;  %p2976_p5 = scmp.ge.s32.totalorder %s3474_s30, 1 }
  0x1c   : > { %p3615_p6 = por %p406_p3, %p192_p0  ;;  %p413_p7 = scmp.lt.s32.totalorder %s3474_s30, 3 }
  0x1d   : > { %s4541_s0 = sld [smem:[#allocation26_spill]]  ;;  %s3476_s22 = smov [#allocation2]  }
  0x1e   : > { %s4539_s17 = scalar_select %p3615_p6, 1, 0 }
  0x1f   : > { %p3623_p8 = pnand %p2976_p5, %p413_p7  ;;  %s428_s23 = sshll.u32 %s3476_s22, 4  ;;  %s429_s23 = int_to_ptr.vmem [resolvable:$true] %s428_s23 }
  0x20   : > { %4540 = sst [smem:[#allocation23_spill]] %s4539_s17  ;;  %p2979_p11 = scmp.ge.s32.totalorder %s3474_s30, 2 }
  0x21   : > { %p3056_p9 = pneg %p3623_p8  ;;  %s3477_s15 = smov 16  }
  0x22   : > { %s3478_s18 = smov 1   ;;  %s39_s19 = sadd.s32 1, %s3470_s29 }
  0x23   : > { %s426_s20 = sshll.u32 %s4541_s0, 4  ;;  %p3631_p10 = pnand %p3056_p9, %p193_p1  ;;  %s427_s20 = int_to_ptr.hbm [resolvable:$true] %s426_s20 }
  0x24   : > { %p40_p12 = scmp.ge.s32.totalorder %s39_s19, 2  ;;  %s179_s22 = sadd.s32 1, %s3462_s27 }
  0x25   : > { %3059 = dma.hbm_to_vmem [thread:$0]  (!%p3631_p10), %s427_s20, 32, %s429_s23, [#allocation3], %s3477_s15, %s3477_s15, %s3478_s18  }
  0x26   : > { %p186_p13 = scmp.ne.s32.totalorder %s3462_s27, %s3458_s26  ;;  %p187_p0 = scmp.eq.s32.totalorder %s3474_s30, 0 }
  0x27   : > { %s4590_s19 = smov (%p40_p12, %s39_s19), 0  ;;  %p3076_p9 = scmp.lt.s32.totalorder %s3474_s30, 2 }
  0x28   : > { %4544 = sst [smem:[#allocation24_spill]] %s4590_s19  ;;  %p3645_p3 = por %p187_p0, %p186_p13 }
  0x29   : > { %p3651_p5 = por %p400_p2, %p186_p13  ;;  %s176_s20 = ssub.s32 %s3470_s29, %s4590_s19 }
  0x2a   : > { %p177_p7 = scmp.eq.s32.totalorder %s176_s20, 0  ;;  %s483_s23 = sand.u32 1, %s3474_s30  }
  0x2b   : > { %s485_s18 = sand.u32 1, %s3462_s27   ;;  %s3031_s12 = sshll.u32 %s3470_s29, 5 }
  0x2c   : > { %s3660_s15 = scalar_select %p177_p7, %s3462_s27, %s179_s22  }
  0x2d   : > { %s2980_s25 = sshll.u32 %s485_s18, 5  ;;  %s4548_s5 = sld [smem:[#allocation31_spill]] }
  0x2e   : > { %4547 = sst [smem:[#allocation25_spill]] %s3660_s15  ;;  %s487_s7 = scalar_lea.vmem [#allocation7], %s2980_s25 }
  0x2f   : > { %s495_s4 = sshll.u32 %s487_s7, 4  ;;  %p3669_p12 = pnand %p3076_p9, %p3645_p3  ;;  %s496_s4 = int_to_ptr.vmem [resolvable:$true] %s495_s4 }
  0x30   : > { %s4550_s1 = sld [smem:[#allocation27_spill]]  ;;  %s3479_s11 = smov [#allocation5]  }
  0x31   : > { %s445_s13 = sshll.u32 %s3479_s11, 4  ;;  %s3481_s29 = smov 8   ;;  %s446_s13 = int_to_ptr.vmem [resolvable:$true] %s445_s13 }
  0x32   : > { %s4551_s8 = sld [smem:[#allocation33_spill]]  ;;  %s521_s27 = scalar_lea.vmem [#allocation8], %s2980_s25 }
  0x33   : > { %s492_s9 = scalar_lea.hbm %s4548_s5, %s3031_s12  ;;  %s484_s5 = scalar_lea.sflag [#allocation3], %s483_s23 }
  0x34   : > { %s493_s10 = sshll.u32 %s492_s9, 4  ;;  %s3480_s9 = smov 128   ;;  %s494_s10 = int_to_ptr.hbm [resolvable:$true] %s493_s10 }
  0x35   : > { %3066 = dma.hbm_to_vmem [thread:$0]  (!%p3669_p12), %s494_s10, 512, %s496_s4, %s484_s5, %s3480_s9, %s3480_s9, %s3481_s29  }
  0x36   : > { %s443_s18 = sshll.u32 %s4550_s1, 4  ;;  %s529_s19 = sshll.u32 %s521_s27, 4  ;;  %s444_s18 = int_to_ptr.hbm [resolvable:$true] %s443_s18  ;;  %s530_s19 = int_to_ptr.vmem [resolvable:$true] %s529_s19 }
  0x37   : > { %3062 = dma.hbm_to_vmem [thread:$0]  (!%p3631_p10), %s444_s18, 256, %s446_s13, [#allocation6], %s3480_s9, %s3480_s9, %s3481_s29  }
  0x38   : > { %s526_s15 = scalar_lea.hbm %s4551_s8, %s3031_s12  ;;  %561 = sbr.rel (%p3623_p8) target bundleno = 2459 (0x99b), region = 68 }
  0x39   : > { %s527_s22 = sshll.u32 %s526_s15, 4  ;;  %s528_s22 = int_to_ptr.hbm [resolvable:$true] %s527_s22 }
  0x3a   : > { %3069 = dma.hbm_to_vmem [thread:$0]  (!%p3669_p12), %s528_s22, 512, %s530_s19, %s484_s5, %s3480_s9, %s3480_s9, %s3481_s29  }
  0x3d   : > { %3433 = dma.done.wait (%p193_p1), [#allocation3], 32  }
  0x3e   : > { %3435 = vsyncadd (%p193_p1), [#allocation3], 4294967264 }
  0x3f   : > { %3437 = dma.done.wait (%p193_p1), [#allocation6], 256  }
  0x40   : > { %3439 = vsyncadd (%p193_p1), [#allocation6], 4294967040  ;;  %s573_s4 = sand.u32 1, %s3601_s14   ;;  %s3697_s5 = sand.u32 1, %s3458_s26  }
  0x41   : > { %s2989_s10 = sshll.u32 %s3697_s5, 5  ;;  %s574_s12 = scalar_lea.sflag [#allocation3], %s573_s4 }
  0x42   : > { %s3700_s25 = scalar_lea.vmem [#allocation7], %s2989_s10 }
  0x43   : > { %3441 = dma.done.wait (%p3610_p4), %s574_s12, 1024  }
  0x44   : > { %3443 = vsyncadd (%p3610_p4), %s574_s12, 4294966272  ;;  %s2991_s27 = sshll.u32 %s3697_s5, 3  ;;  %p670_p1 = scmp.lt.s32.totalorder %s3466_s28, 1 }
  0x45   : > { %s4552_s2 = sld [smem:[#allocation28_spill]]  ;;  %s3749_s7 = scalar_lea.vmem [#allocation10], %s2991_s27 }
  0x46   : > { %s3709_s29 = scalar_select %p670_p1, %s3466_s28, 1 }
  0x47   : > { %s4553_s3 = sld [smem:[#allocation29_spill]]  ;;  %p3000_p4 = scmp.ne.s32.totalorder %s3466_s28, 0 }
  0x48   : > { %s3033_s21 = sshll.u32 %s3709_s29, 5  ;;  %s4554_s19 = sld [smem:[#allocation30_spill]] }
  0x49   : > { %s4555_s1 = sld [smem:[#allocation32_spill]]  ;;  %s3036_s24 = sshll.u32 %s3709_s29, 6 }
  0x4a   : > { %s4556_s26 = sld [smem:[#allocation35_spill]] }
  0x4b   : > { %s674_s18 = scalar_lea.vmem %s4552_s2, %s3033_s21  ;;  %s4557_s30 = sld [smem:[#allocation34_spill]] }
  0x4c   : > { %s4558_s14 = sld [smem:[#allocation36_spill]] }
  0x4d   : > { %s3722_s9 = scalar_lea.vmem %s4553_s3, %s3033_s21 }
  0x4e   : > { %s3727_s22 = scalar_lea.vmem %s4554_s19, %s3033_s21  ;;  %s3747_s21 = scalar_lea.vmem [#allocation8], %s2989_s10 }
  0x4f   : > { %s690_s8 = scalar_lea.vmem %s4555_s1, %s3709_s29  ;;  %708 = sbr.rel (%p3000_p4) target bundleno = 87 (0x57), region = 88 }
  0x50   : > { %s698_s16 = scalar_lea.vmem %s4556_s26, %s3709_s29 }
  0x51   : > { %s3741_s11 = scalar_lea.vmem %s4557_s30, %s3036_s24 }
  0x52   : > { %s701_s0 = scalar_lea.vmem %s4558_s14, %s3709_s29 }
  0x54   : > { %v709_v0 = vld [vmem:[#allocation5] sm:$0xff]  ;;  %vm711_vm0 = vcmask 261120   ;;  %v710_v1 = vld [vmem:[#allocation5 + $0x8] sm:$0xff] }
  0x55   : > { %712 = vst.msk [vmem:[#allocation9] sm:$0xff] %vm711_vm0, %v709_v0 }
  0x56   : > { %713 = vst.msk [vmem:[#allocation9 + $0x8] sm:$0xff] %vm711_vm0, %v710_v1 }
  0x57 PF: > { %v719_v2 = vld [vmem:[%s674_s18 + $0x10] sm:$0xff]  ;;  %v720_v3 = vld [vmem:[%s674_s18 + $0x18] sm:$0xff]  ;;  %v717_v11 = vld [vmem:[%s674_s18] sm:$0xff]  ;;  %vm4518_vm1 = vcmask 261120   ;;  %s3482_s1 = smov 112   ;;  %s3483_s2 = smov 104  }
  0x58   : > { %v743_v4 = vld [vmem:[%s3722_s9 + $0x10] sm:$0xff]  ;;  %v722_v5 = vpack.c.bf16 %v720_v3, %v719_v2  ;;  %v744_v6 = vld [vmem:[%s3722_s9 + $0x18] sm:$0xff]  ;;  %v718_v12 = vld [vmem:[%s674_s18 + $0x8] sm:$0xff]  ;;  %s3484_s3 = smov 120   ;;  %v3485_v26 = vmov 1983009808   ;;  %s4566_s18 = scalar_lea.vmem %s4499_s6, %s3709_s29 }
  0x59   : > { %v763_v7 = vld [vmem:[%s3727_s22 + $0x10] sm:$0xff]  ;;  %v764_v8 = vld [vmem:[%s3727_s22 + $0x18] sm:$0xff]  ;;  %v746_v9 = vpack.c.bf16 %v744_v6, %v743_v4  ;;  %v741_v13 = vld [vmem:[%s3722_s9] sm:$0xff]  ;;  %v721_v14 = vpack.c.bf16 %v718_v12, %v717_v11  ;;  %v804_v27 = vunpack.c.l.s4 %v3485_v26  ;;  %vm799_vm2 = vcmask 1047556   ;;  %s3488_s26 = smov 24   ;;  %s3489_s30 = smov 16  }
  0x5a   : > { %v766_v10 = vpack.c.bf16 %v764_v8, %v763_v7  ;;  %733 = vmatpush.bf16.msra.mxu0 %v722_v5  ;;  %v742_v15 = vld [vmem:[%s3722_s9 + $0x8] sm:$0xff]  ;;  %v761_v16 = vld [vmem:[%s3727_s22] sm:$0xff]  ;;  %v3486_v39 = vmov 1934713408   ;;  %vm1162_vm3 = vcmask 64512   ;;  %vm1454_vm8 = vcmask 1043456  }
  0x5b   : > { %v762_v17 = vld [vmem:[%s3727_s22 + $0x8] sm:$0xff]  ;;  %753 = vmatpush.bf16.msra.mxu1 %v746_v9  ;;  %v745_v18 = vpack.c.bf16 %v742_v15, %v741_v13  ;;  %v3770_v35 = vunpack.c.0.s8 %v804_v27  ;;  %v828_v40 = vunpack.c.l.s4 %v3486_v39  ;;  %s3490_s14 = smov 8   ;;  %s3492_s10 = smov 32  }
  0x5c   : > { %773 = vmatpush.bf16.msra.mxu2 %v766_v10  ;;  %v765_v19 = vpack.c.bf16 %v762_v17, %v761_v16  ;;  %v714_v20 = vld [vmem:[#allocation9] sm:$0xff]  ;;  %s3495_s4 = smov 56   ;;  %s3037_s20 = sshll.u32 %s3466_s28, 3 }
  0x5d   : > { %v715_v21 = vld [vmem:[#allocation9 + $0x8] sm:$0xff]  ;;  %v3779_v48 = vunpack.c.0.s8 %v828_v40  ;;  %s2744_s28 = sshll.u32 %s3749_s7, 4  ;;  %s2713_s15 = scalar_lea.sflag [#allocation11], %s3697_s5  ;;  %s4442_s28 = int_to_ptr.vmem [resolvable:$true] %s2744_s28 }
  0x5e   : > { %v716_v22 = vpack.c.bf16 %v715_v21, %v714_v20  ;;  %734 = vmatpush.bf16.msra.mxu0 %v721_v14 }
  0x5f   : > { %754 = vmatpush.bf16.msra.mxu1 %v745_v18 }
  0x60   : > { %774 = vmatpush.bf16.msra.mxu2 %v765_v19 }
  0x61   : > { %3001 = vmatmul.msk.bf16.vlgmr.msra.gmra.mxu0 %vm4518_vm1, %v716_v22 }
  0x62   : > { %3002 = vmatmul.msk.bf16.vlgmr.msra.gmra.mxu1 %vm4518_vm1, %v716_v22 }
  0x63   : > { %3003 = vmatmul.msk.bf16.vlgmr.msra.gmra.mxu2 %vm4518_vm1, %v716_v22 }
  0xde   : > { %v736_v23 = vpop.f32.mrf.mxu0 }
  0xdf   : > { %v756_v24 = vpop.f32.mrf.mxu1  ;;  %792 = vrot.lane.b32.xlu2 %v736_v23, %s3482_s1  ;;  %v801_v33 = vrot.slane %v736_v23, 4 }
  0xe0   : > { %916 = vrot.lane.b32.xlu1 %v756_v24, %s3483_s2  ;;  %910 = vrot.lane.b32.xlu0 %v756_v24, %s3484_s3  ;;  %v921_v46 = vrot.slane %v756_v24, 4 }
  0xe7   : > { %795 = vrot.lane.b32.xlu2 %v736_v23, %s3483_s2 }
  0xe8   : > { %913 = vrot.lane.b32.xlu0 %v756_v24, %s3482_s1  ;;  %789 = vrot.lane.b32.xlu1 %v736_v23, %s3484_s3 }
 0x139   : > { %v793_v25 = vpop.permute.xlu2 %792 }
 0x13a   : > { %v798_v28 = vrot.slane %v793_v25, 4  ;;  %v802_v41 = vsel %vm799_vm2, %v793_v25, %v801_v33 }
 0x13b   : > { %v810_v47 = vperm.slane %v802_v41, %v3770_v35 }
 0x13c   : > { %v800_v36 = vsel %vm799_vm2, %v798_v28, %v736_v23 }
 0x13d   : > { %v806_v43 = vperm.slane %v800_v36, %v3770_v35  ;;  %v837_v2 = vrot.slane %v810_v47, 4 }
 0x13f   : > { %v825_v58 = vrot.slane %v806_v43, 4 }
 0x141   : > { %v796_v38 = vpop.permute.xlu2 %795 }
 0x142   : > { %v811_v45 = vrot.slane %v796_v38, 4 }
 0x152   : > { %v917_v29 = vpop.permute.xlu1 %916  ;;  %v911_v30 = vpop.permute.xlu0 %910 }
 0x153   : > { %v931_v31 = vrot.slane %v917_v29, 4  ;;  %v933_v32 = vrot.slane %v911_v30, 4 }
 0x155   : > { %v934_v34 = vsel %vm799_vm2, %v917_v29, %v933_v32  ;;  %v932_v37 = vsel %vm799_vm2, %v931_v31, %v911_v30 }
 0x156   : > { %v942_v42 = vperm.slane %v934_v34, %v3770_v35  ;;  %v938_v44 = vperm.slane %v932_v37, %v3770_v35 }
 0x158   : > { %v955_v55 = vrot.slane %v942_v42, 4  ;;  %v943_v59 = vrot.slane %v938_v44, 4 }
 0x15a   : > { %v914_v49 = vpop.permute.xlu0 %913  ;;  %v790_v50 = vpop.permute.xlu1 %789 }
 0x15b   : > { %v919_v51 = vrot.slane %v914_v49, 4  ;;  %v922_v52 = vsel %vm799_vm2, %v914_v49, %v921_v46  ;;  %v812_v53 = vsel %vm799_vm2, %v811_v45, %v790_v50  ;;  %v813_v54 = vrot.slane %v790_v50, 4 }
 0x15c   : > { %v930_v56 = vperm.slane %v922_v52, %v3770_v35  ;;  %v818_v57 = vperm.slane %v812_v53, %v3770_v35 }
 0x15d   : > { %v920_v60 = vsel %vm799_vm2, %v919_v51, %v756_v24  ;;  %v814_v61 = vsel %vm799_vm2, %v796_v38, %v813_v54 }
 0x15e   : > { %v926_v62 = vperm.slane %v920_v60, %v3770_v35  ;;  %v956_v63 = vsel %vm799_vm2, %v955_v55, %v930_v56  ;;  %v957_v0 = vrot.slane %v930_v56, 4  ;;  %v822_v1 = vperm.slane %v814_v61, %v3770_v35 }
 0x15f   : > { %v962_v3 = vperm.slane %v956_v63, %v3779_v48  ;;  %v823_v4 = vrot.slane %v818_v57, 4  ;;  %v826_v5 = vsel %vm799_vm2, %v818_v57, %v825_v58 }
 0x160   : > { %v944_v6 = vsel %vm799_vm2, %v943_v59, %v926_v62  ;;  %v945_v7 = vrot.slane %v926_v62, 4  ;;  %v958_v8 = vsel %vm799_vm2, %v942_v42, %v957_v0  ;;  %v834_v9 = vperm.slane %v826_v5, %v3779_v48 }
 0x161   : > { %v950_v10 = vperm.slane %v944_v6, %v3779_v48  ;;  %v966_v11 = vperm.slane %v958_v8, %v3779_v48  ;;  %v971_v12 = vrot.slane %v962_v3, 4  ;;  %v824_v13 = vsel %vm799_vm2, %v823_v4, %v806_v43 }
 0x162   : > { %v946_v14 = vsel %vm799_vm2, %v938_v44, %v945_v7  ;;  %v830_v15 = vperm.slane %v824_v13, %v3779_v48  ;;  %v835_v16 = vrot.slane %v822_v1, 4  ;;  %v838_v17 = vsel %vm799_vm2, %v822_v1, %v837_v2 }
 0x163   : > { %v954_v18 = vperm.slane %v946_v14, %v3779_v48  ;;  %v967_v19 = vrot.slane %v950_v10, 4  ;;  %v972_v20 = vsel %vm799_vm2, 0.0, %v971_v12  ;;  %v973_v21 = vrot.slane %v966_v11, 4 }
 0x164   : > { %v836_v22 = vsel %vm799_vm2, %v835_v16, %v810_v47  ;;  %v846_v23 = vperm.slane %v838_v17, %v3779_v48  ;;  %v847_v24 = vrot.slane %v830_v15, 4  ;;  %v849_v25 = vrot.slane %v834_v9, 4 }
 0x165   : > { %v969_v26 = vrot.slane %v954_v18, 4  ;;  %v974_v27 = vsel %vm799_vm2, 0.0, %v973_v21  ;;  %v986_v28 = vsel %vm799_vm2, %v973_v21, %v962_v3  ;;  %v842_v29 = vperm.slane %v836_v22, %v3779_v48 }
 0x166   : > { %v990_v30 = vperm.slane %v986_v28, %v3770_v35  ;;  %v991_v31 = vrot.slane %v974_v27, 4  ;;  %v848_v32 = vsel %vm799_vm2, 0.0, %v847_v24  ;;  %v850_v33 = vsel %vm799_vm2, 0.0, %v849_v25 }
 0x167   : > { %v970_v34 = vsel %vm799_vm2, 0.0, %v969_v26  ;;  %v851_v36 = vrot.slane %v842_v29, 4  ;;  %v853_v37 = vrot.slane %v846_v23, 4  ;;  %v855_v38 = vsel %vm799_vm2, %v849_v25, %v830_v15 }
 0x168   : > { %v980_v39 = vrot.slane %v970_v34, 4  ;;  %v992_v40 = vsel %vm799_vm2, %v991_v31, %v972_v20  ;;  %v859_v41 = vperm.slane %v855_v38, %v3770_v35  ;;  %v860_v42 = vrot.slane %v850_v33, 4 }
 0x169   : > { %v852_v43 = vsel %vm799_vm2, 0.0, %v851_v36  ;;  %v854_v44 = vsel %vm799_vm2, 0.0, %v853_v37  ;;  %v866_v45 = vsel %vm799_vm2, %v853_v37, %v842_v29  ;;  %v968_v46 = vsel %vm799_vm2, 0.0, %v967_v19 }
 0x16a   : > { %v861_v47 = vsel %vm799_vm2, %v860_v42, %v848_v32  ;;  %v870_v49 = vperm.slane %v866_v45, %v3770_v35  ;;  %v871_v50 = vrot.slane %v854_v44, 4  ;;  %v879_v51 = vrot.slane %v859_v41, 4 }
 0x16b   : > { %v865_v52 = vperm.slane %v861_v47, %v3770_v35  ;;  %v975_v53 = vsel %vm799_vm2, %v969_v26, %v950_v10  ;;  %v981_v54 = vsel %vm799_vm2, %v980_v39, %v968_v46  ;;  %v996_v55 = vperm.slane %v992_v40, %v3770_v35 }
 0x16c   : > { %v872_v56 = vsel %vm799_vm2, %v871_v50, %v852_v43  ;;  %v979_v57 = vperm.slane %v975_v53, %v3770_v35  ;;  %v985_v58 = vperm.slane %v981_v54, %v3770_v35  ;;  %v1011_v59 = vrot.slane %v990_v30, 4  ;;  %v3862_v53 = vpop.f32.mrf.mxu1  ;;  %v3864_v54 = vpop.f32.mrf.mxu2 }
 0x16d   : > { %v1009_v60 = vrot.slane %v996_v55, 4  ;;  %v876_v61 = vperm.slane %v872_v56, %v3770_v35  ;;  %v891_v62 = vrot.slane %v870_v49, 4  ;;  %v880_v2 = vsel %vm799_vm2, %v865_v52, %v879_v51 }
 0x16e   : > { %v999_v63 = vrot.slane %v979_v57, 4  ;;  %v1012_v0 = vsel %vm799_vm2, %v996_v55, %v1011_v59  ;;  %v997_v1 = vrot.slane %v985_v58, 4  ;;  %v877_v6 = vrot.slane %v865_v52, 4 }
 0x16f   : > { %v1020_v3 = vperm.slane %v1012_v0, %v3779_v48  ;;  %v1010_v4 = vsel %vm799_vm2, %v1009_v60, %v990_v30  ;;  %v892_v5 = vsel %vm799_vm2, %v876_v61, %v891_v62  ;;  %v888_v16 = vperm.slane %v880_v2, %v3779_v48 }
 0x170   : > { %v1000_v7 = vsel %vm799_vm2, %v985_v58, %v999_v63  ;;  %v998_v8 = vsel %vm799_vm2, %v997_v1, %v979_v57  ;;  %v1016_v9 = vperm.slane %v1010_v4, %v3779_v48  ;;  %v900_v10 = vperm.slane %v892_v5, %v3779_v48  ;;  %v3870_v58 = vpop.f32.mrf.mxu0 }
 0x171   : > { %v1008_v11 = vperm.slane %v1000_v7, %v3779_v48  ;;  %v1025_v12 = vrot.slane %v1020_v3, 4  ;;  %v1004_v13 = vperm.slane %v998_v8, %v3779_v48  ;;  %v878_v14 = vsel %vm799_vm2, %v877_v6, %v859_v41 }
 0x172   : > { %v1021_v15 = vrot.slane %v1016_v9, 4  ;;  %v889_v17 = vrot.slane %v876_v61, 4  ;;  %v884_v21 = vperm.slane %v878_v14, %v3779_v48  ;;  %v905_v28 = vrot.slane %v900_v10, 4 }
 0x173   : > { %v1026_v18 = vsel %vm799_vm2, %v1025_v12, %v1008_v11  ;;  %v1027_v19 = vrot.slane %v1008_v11, 4  ;;  %v1023_v20 = vrot.slane %v1004_v13, 4  ;;  %v907_v36 = vrot.slane %v888_v16, 4 }
 0x174   : > { %v1160_v22 = vpack.c.bf16 %v1026_v18, %v1026_v18  ;;  %v1022_v23 = vsel %vm799_vm2, %v1021_v15, %v1004_v13  ;;  %v890_v24 = vsel %vm799_vm2, %v889_v17, %v870_v49  ;;  %v903_v34 = vrot.slane %v884_v21, 4  ;;  %v786_v49 = vld [vmem:[#allocation2] sm:$0x1]  ;;  %v3874_v59 = vpop.f32.mrf.mxu2 }
 0x175   : > { %v1158_v25 = vpack.c.bf16 %v1022_v23, %v1022_v23  ;;  %v1028_v26 = vsel %vm799_vm2, %v1020_v3, %v1027_v19  ;;  %v1024_v27 = vsel %vm799_vm2, %v1016_v9, %v1023_v20  ;;  %v896_v32 = vperm.slane %v890_v24, %v3779_v48 }
 0x176   : > { %v1205_v29 = vsel %vm1162_vm3, %v1160_v22, 0  ;;  %v1161_v30 = vpack.c.bf16 %v1028_v26, %v1028_v26  ;;  %v1159_v31 = vpack.c.bf16 %v1024_v27, %v1024_v27  ;;  %v906_v40 = vsel %vm799_vm2, %v905_v28, %v888_v16 }
 0x177   : > { %1214 = vmatpush.bf16.xpose.msrb.mxu1 %v1205_v29  ;;  %v1167_v33 = vsel %vm1162_vm3, %v1158_v25, 0  ;;  %v901_v39 = vrot.slane %v896_v32, 4  ;;  %v908_v42 = vsel %vm799_vm2, %v900_v10, %v907_v36  ;;  %v904_v43 = vsel %vm799_vm2, %v896_v32, %v903_v34 }
 0x178   : > { %1176 = vmatpush.bf16.xpose.msra.mxu3 %v1167_v33  ;;  %v1224_v37 = vsel %vm1162_vm3, %v1161_v30, 0  ;;  %v1186_v38 = vsel %vm1162_vm3, %v1159_v31, 0  ;;  %v1156_v44 = vpack.c.bf16 %v906_v40, %v906_v40  ;;  %v1157_v46 = vpack.c.bf16 %v908_v42, %v908_v42 }
 0x179   : > { %1233 = vmatpush.bf16.xpose.msrb.mxu2 %v1224_v37  ;;  %1195 = vmatpush.bf16.xpose.msrb.mxu0 %v1186_v38  ;;  %v902_v41 = vsel %vm799_vm2, %v901_v39, %v884_v21  ;;  %v1155_v47 = vpack.c.bf16 %v904_v43, %v904_v43  ;;  %vm1149_vm4 = vcmp.gt.f32.partialorder %v786_v49, 0.0  ;;  %v781_v50 = vlaneseq }
 0x17a   : > { %v1154_v45 = vpack.c.bf16 %v902_v41, %v902_v41  ;;  %v3487_v51 = vmov 0   ;;  %v3154_v16 = vpack.i.bf16 %v3862_v53, %v3864_v54 }
 0x17b   : > { %v1150_v52 = vsel %vm1149_vm4, 1, %v3487_v51  ;;  %v3866_v55 = vshrl.u32 %v781_v50, 7  ;;  %v3868_v56 = vand.u32 127, %v781_v50 }
 0x17c   : > { %v1151_v57 = vperm.slane %v1150_v52, 0 }
 0x17d   : > { %vm785_vm5 = vcmp.gt.s32.totalorder %v3868_v56, %v3866_v55 }
 0x17e   : > { %3006 = vmatmul.msk.bf16.vlgmr.msrb.gmra.mxu1 %vm1162_vm3, %v1156_v44  ;;  %vm1152_vm6 = vcmp.eq.s32.totalorder %v1151_v57, 1 }
 0x17f   : > { %3004 = vmatmul.msk.bf16.vlgmr.msra.gmra.mxu3 %vm1162_vm3, %v1154_v45  ;;  %vm1153_vm7 = vmor %vm785_vm5, %vm1152_vm6 }
 0x180   : > { %3007 = vmatmul.msk.bf16.vlgmr.msrb.gmra.mxu2 %vm1162_vm3, %v1157_v46  ;;  %3005 = vmatmul.msk.bf16.vlgmr.msrb.gmra.mxu0 %vm1162_vm3, %v1155_v47 }
 0x1fb   : > { %v1216_v60 = vpop.f32.mrf.mxu1 }
 0x1fc   : > { %v1241_v61 = vmul.f32 3.535534, %v1216_v60  ;;  %v1785_v60 = vrot.slane %v3862_v53, 4 }
 0x1fd   : > { %v1197_v62 = vpop.f32.mrf.mxu0 }
 0x1fe   : > { %v1247_v63 = vsel %vm1153_vm7, -1e+09, %v1241_v61  ;;  %v1240_v1 = vmul.f32 3.535534, %v1197_v62  ;;  %v1041_v61 = vrot.slane %v3864_v54, 4 }
 0x1ff   : > { %v1255_v0 = vsel %vm1162_vm3, %v1247_v63, -inf }
 0x200   : > { %1256 = vmax.xlane.f32.xlu2 %v1255_v0  ;;  %v1246_v7 = vsel %vm1153_vm7, -1e+09, %v1240_v1 }
 0x201   : > { %v1252_v13 = vsel %vm1162_vm3, %v1246_v7, -inf }
 0x202   : > { %v1178_v2 = vpop.f32.mrf.mxu3 }
 0x203   : > { %v1239_v3 = vmul.f32 3.535534, %v1178_v2  ;;  %v1218_v4 = vpop.f32.mrf.mxu1  ;;  %v1235_v5 = vpop.f32.mrf.mxu2 }
 0x204   : > { %v1242_v6 = vmul.f32 3.535534, %v1235_v5 }
 0x205   : > { %v1199_v8 = vpop.f32.mrf.mxu0  ;;  %v1245_v9 = vsel %vm1153_vm7, -1e+09, %v1239_v3 }
 0x206   : > { %v1248_v10 = vsel %vm1153_vm7, -1e+09, %v1242_v6  ;;  %v1249_v11 = vsel %vm1162_vm3, %v1245_v9, -inf }
 0x207   : > { %v1258_v12 = vsel %vm1162_vm3, %v1248_v10, -inf  ;;  %1250 = vmax.xlane.f32.xlu0 %v1249_v11 }
 0x208   : > { %1259 = vmax.xlane.f32.xlu1 %v1258_v12  ;;  %1253 = vmax.xlane.f32.xlu2 %v1252_v13 }
 0x20a   : > { %v1180_v14 = vpop.f32.mrf.mxu3 }
 0x20b   : > { %v1237_v15 = vpop.f32.mrf.mxu2 }
 0x21b   : > { %3155 = vrot.lane.b32.xlu0 %v3154_v16, %s3484_s3 }
 0x220   : > { %3165 = vrot.lane.b32.xlu2 %v3154_v16, %s3483_s2 }
 0x221   : > { %3160 = vrot.lane.b32.xlu1 %v3154_v16, %s3482_s1 }
 0x273   : > { %v1257_v17 = vpop.xlane.xlu2 %1256 }
 0x274   : > { %v1263_v18 = vsub.f32 %v1247_v63, %v1257_v17 }
 0x276   : > { %v1269_v19 = vmul.f32 1.442695, %v1263_v18 }
 0x278   : > { %3188 = vpow2.f32 %v1269_v19 }
 0x27a   : > { %v1251_v20 = vpop.xlane.xlu0 %1250 }
 0x27b   : > { %v1260_v21 = vpop.xlane.xlu1 %1259  ;;  %v1261_v22 = vsub.f32 %v1245_v9, %v1251_v20  ;;  %v1254_v23 = vpop.xlane.xlu2 %1253 }
 0x27c   : > { %v1264_v24 = vsub.f32 %v1248_v10, %v1260_v21  ;;  %v1262_v25 = vsub.f32 %v1246_v7, %v1254_v23 }
 0x27d   : > { %v1265_v26 = vmul.f32 1.442695, %v1261_v22 }
 0x27e   : > { %v3888_v27 = vpop.eup %3188  ;;  %v1271_v28 = vmul.f32 1.442695, %v1264_v24  ;;  %v1267_v29 = vmul.f32 1.442695, %v1262_v25 }
 0x27f   : > { %3190 = vpow2.f32 %v1265_v26  ;;  %v1279_v30 = vsel %vm1162_vm3, %v3888_v27, 0.0 }
 0x280   : > { %3192 = vpow2.f32 %v1271_v28  ;;  %1280 = vadd.xlane.f32.xlu2 %v1279_v30 }
 0x281   : > { %3194 = vpow2.f32 %v1267_v29 }
 0x283   : > { %v3166_v37 = vpop.permute.xlu2 %3165 }
 0x284   : > { %v3168_v39 = vunpack.i.h.bf16 %v3166_v37  ;;  %v3167_v40 = vunpack.i.l.bf16 %v3166_v37 }
 0x285   : > { %v3892_v31 = vpop.eup %3190 }
 0x286   : > { %v3894_v32 = vpop.eup %3192  ;;  %v1273_v33 = vsel %vm1162_vm3, %v3892_v31, 0.0  ;;  %v1795_v44 = vrot.slane %v3168_v39, 4  ;;  %v1051_v45 = vrot.slane %v3167_v40, 4 }
 0x287   : > { %v3898_v34 = vpop.eup %3194  ;;  %v1282_v36 = vsel %vm1162_vm3, %v3894_v32, 0.0  ;;  %1274 = vadd.xlane.f32.xlu0 %v1273_v33 }
 0x288   : > { %1283 = vadd.xlane.f32.xlu1 %v1282_v36  ;;  %v1276_v38 = vsel %vm1162_vm3, %v3898_v34, 0.0 }
 0x289   : > { %1277 = vadd.xlane.f32.xlu2 %v1276_v38 }
 0x28d   : > { %v3156_v41 = vpop.permute.xlu0 %3155 }
 0x28e   : > { %v3158_v42 = vunpack.i.h.bf16 %v3156_v41  ;;  %v3157_v43 = vunpack.i.l.bf16 %v3156_v41 }
 0x290   : > { %v1797_v46 = vrot.slane %v3158_v42, 4  ;;  %v1053_v47 = vrot.slane %v3157_v43, 4  ;;  %v1052_v49 = vsel %vm799_vm2, %v1051_v45, %v3157_v43  ;;  %v1796_v50 = vsel %vm799_vm2, %v1795_v44, %v3158_v42 }
 0x291   : > { %v1058_v1 = vperm.slane %v1052_v49, %v3770_v35  ;;  %v1802_v2 = vperm.slane %v1796_v50, %v3770_v35 }
 0x292   : > { %v1054_v52 = vsel %vm799_vm2, %v3167_v40, %v1053_v47  ;;  %v1798_v57 = vsel %vm799_vm2, %v3168_v39, %v1797_v46 }
 0x293   : > { %v1062_v62 = vperm.slane %v1054_v52, %v3770_v35  ;;  %v1806_v63 = vperm.slane %v1798_v57, %v3770_v35  ;;  %v3161_v0 = vpop.permute.xlu1 %3160  ;;  %v1063_v13 = vrot.slane %v1058_v1, 4  ;;  %v1807_v14 = vrot.slane %v1802_v2, 4 }
 0x294   : > { %v3163_v3 = vunpack.i.h.bf16 %v3161_v0  ;;  %v3162_v4 = vunpack.i.l.bf16 %v3161_v0 }
 0x295   : > { %v1075_v5 = vrot.slane %v1062_v62, 4  ;;  %v1819_v6 = vrot.slane %v1806_v63, 4 }
 0x296   : > { %v1783_v7 = vrot.slane %v3163_v3, 4  ;;  %v1786_v8 = vsel %vm799_vm2, %v3163_v3, %v1785_v60  ;;  %v1039_v9 = vrot.slane %v3162_v4, 4  ;;  %v1042_v10 = vsel %vm799_vm2, %v3162_v4, %v1041_v61 }
 0x297   : > { %v1794_v11 = vperm.slane %v1786_v8, %v3770_v35  ;;  %v1050_v12 = vperm.slane %v1042_v10, %v3770_v35 }
 0x298   : > { %v1784_v15 = vsel %vm799_vm2, %v1783_v7, %v3862_v53  ;;  %v1040_v16 = vsel %vm799_vm2, %v1039_v9, %v3864_v54 }
 0x299   : > { %v1790_v17 = vperm.slane %v1784_v15, %v3770_v35  ;;  %v1821_v18 = vrot.slane %v1794_v11, 4  ;;  %v1046_v19 = vperm.slane %v1040_v16, %v3770_v35  ;;  %v1076_v20 = vsel %vm799_vm2, %v1075_v5, %v1050_v12 }
 0x29a   : > { %v1077_v21 = vrot.slane %v1050_v12, 4  ;;  %v1082_v22 = vperm.slane %v1076_v20, %v3779_v48  ;;  %v1820_v23 = vsel %vm799_vm2, %v1819_v6, %v1794_v11 }
 0x29b   : > { %v1809_v24 = vrot.slane %v1790_v17, 4  ;;  %v1064_v25 = vsel %vm799_vm2, %v1063_v13, %v1046_v19  ;;  %v1065_v26 = vrot.slane %v1046_v19, 4  ;;  %v1808_v53 = vsel %vm799_vm2, %v1807_v14, %v1790_v17  ;;  %1654 = vrot.lane.b32.xlu0 %v3870_v58, %s3484_s3 }
 0x29c   : > { %v1070_v54 = vperm.slane %v1064_v25, %v3779_v48  ;;  %v1078_v28 = vsel %vm799_vm2, %v1062_v62, %v1077_v21  ;;  %v1091_v29 = vrot.slane %v1082_v22, 4  ;;  %v1814_v30 = vperm.slane %v1808_v53, %v3779_v48 }
 0x29d   : > { %v1066_v33 = vsel %vm799_vm2, %v1058_v1, %v1065_v26  ;;  %v1086_v36 = vperm.slane %v1078_v28, %v3779_v48  ;;  %v1810_v37 = vsel %vm799_vm2, %v1802_v2, %v1809_v24  ;;  %v1822_v38 = vsel %vm799_vm2, %v1806_v63, %v1821_v18 }
 0x29e   : > { %v1074_v39 = vperm.slane %v1066_v33, %v3779_v48  ;;  %v1087_v40 = vrot.slane %v1070_v54, 4  ;;  %v1818_v41 = vperm.slane %v1810_v37, %v3779_v48  ;;  %v1826_v43 = vperm.slane %v1820_v23, %v3779_v48 }
 0x29f   : > { %v1093_v42 = vrot.slane %v1086_v36, 4  ;;  %v1830_v44 = vperm.slane %v1822_v38, %v3779_v48  ;;  %v1831_v45 = vrot.slane %v1814_v30, 4  ;;  %v1092_v47 = vsel %vm799_vm2, 0.0, %v1091_v29 }
 0x2a0   : > { %v1089_v46 = vrot.slane %v1074_v39, 4  ;;  %v1833_v49 = vrot.slane %v1818_v41, 4  ;;  %v1088_v50 = vsel %vm799_vm2, 0.0, %v1087_v40  ;;  %v1835_v2 = vrot.slane %v1826_v43, 4 }
 0x2a1   : > { %v1094_v52 = vsel %vm799_vm2, 0.0, %v1093_v42  ;;  %v1106_v57 = vsel %vm799_vm2, %v1093_v42, %v1082_v22  ;;  %v1832_v60 = vsel %vm799_vm2, 0.0, %v1831_v45  ;;  %1660 = vrot.lane.b32.xlu2 %v3870_v58, %s3483_s2  ;;  %1657 = vrot.lane.b32.xlu1 %v3870_v58, %s3482_s1  ;;  %v1837_v3 = vrot.slane %v1830_v44, 4 }
 0x2a2   : > { %v1090_v61 = vsel %vm799_vm2, 0.0, %v1089_v46  ;;  %v1110_v62 = vperm.slane %v1106_v57, %v3770_v35  ;;  %v1111_v63 = vrot.slane %v1094_v52, 4  ;;  %v1834_v0 = vsel %vm799_vm2, 0.0, %v1833_v49 }
 0x2a3   : > { %v1100_v1 = vrot.slane %v1090_v61, 4  ;;  %v1844_v4 = vrot.slane %v1834_v0, 4  ;;  %v1095_v5 = vsel %vm799_vm2, %v1089_v46, %v1070_v54  ;;  %v1839_v8 = vsel %vm799_vm2, %v1833_v49, %v1814_v30 }
 0x2a4   : > { %v1112_v6 = vsel %vm799_vm2, %v1111_v63, %v1092_v47  ;;  %v1131_v7 = vrot.slane %v1110_v62, 4  ;;  %v1838_v9 = vsel %vm799_vm2, 0.0, %v1837_v3  ;;  %v1850_v10 = vsel %vm799_vm2, %v1837_v3, %v1826_v43 }
 0x2a5   : > { %v1099_v11 = vperm.slane %v1095_v5, %v3770_v35  ;;  %v1101_v12 = vsel %vm799_vm2, %v1100_v1, %v1088_v50  ;;  %v1854_v13 = vperm.slane %v1850_v10, %v3770_v35  ;;  %v1855_v14 = vrot.slane %v1838_v9, 4 }
 0x2a6   : > { %v1105_v15 = vperm.slane %v1101_v12, %v3770_v35  ;;  %v1116_v16 = vperm.slane %v1112_v6, %v3770_v35  ;;  %v1836_v17 = vsel %vm799_vm2, 0.0, %v1835_v2  ;;  %v1843_v19 = vperm.slane %v1839_v8, %v3770_v35 }
 0x2a7   : > { %v1119_v18 = vrot.slane %v1099_v11, 4  ;;  %v1845_v20 = vsel %vm799_vm2, %v1844_v4, %v1832_v60  ;;  %v1856_v23 = vsel %vm799_vm2, %v1855_v14, %v1836_v17  ;;  %v1875_v24 = vrot.slane %v1854_v13, 4 }
 0x2a8   : > { %v1132_v21 = vsel %vm799_vm2, %v1116_v16, %v1131_v7  ;;  %v1849_v22 = vperm.slane %v1845_v20, %v3770_v35  ;;  %v1860_v53 = vperm.slane %v1856_v23, %v3770_v35  ;;  %v1863_v54 = vrot.slane %v1843_v19, 4 }
 0x2a9   : > { %v1120_v25 = vsel %vm799_vm2, %v1105_v15, %v1119_v18  ;;  %v1140_v26 = vperm.slane %v1132_v21, %v3779_v48  ;;  %v1117_v29 = vrot.slane %v1105_v15, 4  ;;  %v1129_v30 = vrot.slane %v1116_v16, 4 }
 0x2aa   : > { %v1128_v28 = vperm.slane %v1120_v25, %v3779_v48  ;;  %v1861_v33 = vrot.slane %v1849_v22, 4  ;;  %v1864_v37 = vsel %vm799_vm2, %v1849_v22, %v1863_v54  ;;  %v1876_v38 = vsel %vm799_vm2, %v1860_v53, %v1875_v24 }
 0x2ab   : > { %v1145_v36 = vrot.slane %v1140_v26, 4  ;;  %v1873_v39 = vrot.slane %v1860_v53, 4  ;;  %v1872_v40 = vperm.slane %v1864_v37, %v3779_v48  ;;  %v1884_v41 = vperm.slane %v1876_v38, %v3779_v48 }
 0x2ac   : > { %v1118_v42 = vsel %vm799_vm2, %v1117_v29, %v1099_v11  ;;  %v1130_v43 = vsel %vm799_vm2, %v1129_v30, %v1110_v62  ;;  %v1147_v47 = vrot.slane %v1128_v28, 4  ;;  %v1862_v52 = vsel %vm799_vm2, %v1861_v33, %v1843_v19 }
 0x2ad   : > { %v1146_v44 = vsel %vm799_vm2, %v1145_v36, %v1128_v28  ;;  %v1124_v45 = vperm.slane %v1118_v42, %v3779_v48  ;;  %v1136_v46 = vperm.slane %v1130_v43, %v3779_v48  ;;  %v1889_v50 = vrot.slane %v1884_v41, 4 }
 0x2ae   : > { %v1449_v49 = vpack.c.bf16 %v1146_v44, %v1146_v44  ;;  %v1874_v57 = vsel %vm799_vm2, %v1873_v39, %v1854_v13  ;;  %v1148_v63 = vsel %vm799_vm2, %v1140_v26, %v1147_v47  ;;  %v1868_v0 = vperm.slane %v1862_v52, %v3779_v48 }
 0x2af   : > { %v1141_v60 = vrot.slane %v1136_v46, 4  ;;  %v1143_v61 = vrot.slane %v1124_v45, 4  ;;  %v1890_v1 = vsel %vm799_vm2, %v1889_v50, %v1872_v40  ;;  %v1450_v2 = vpack.c.bf16 %v1148_v63, %v1148_v63 }
 0x2b0   : > { %v1494_v62 = vsel %vm1454_vm8, %v1449_v49, 0  ;;  %v1880_v3 = vperm.slane %v1874_v57, %v3779_v48  ;;  %v2024_v4 = vpack.c.bf16 %v1890_v1, %v1890_v1  ;;  %v1891_v6 = vrot.slane %v1872_v40, 4 }
 0x2b1   : > { %1503 = vmatpush.bf16.msra.mxu1 %v1494_v62  ;;  %v1142_v5 = vsel %vm799_vm2, %v1141_v60, %v1124_v45  ;;  %v1144_v7 = vsel %vm799_vm2, %v1136_v46, %v1143_v61  ;;  %v1513_v9 = vsel %vm1454_vm8, %v1450_v2, 0  ;;  %v1887_v14 = vrot.slane %v1868_v0, 4 }
 0x2b2   : > { %v1447_v8 = vpack.c.bf16 %v1142_v5, %v1142_v5  ;;  %v1885_v10 = vrot.slane %v1880_v3, 4  ;;  %v1448_v11 = vpack.c.bf16 %v1144_v7, %v1144_v7  ;;  %v2068_v12 = vsel %vm1162_vm3, %v2024_v4, 0  ;;  %1522 = vmatpush.bf16.msra.mxu2 %v1513_v9 }
 0x2b3   : > { %v1892_v13 = vsel %vm799_vm2, %v1884_v41, %v1891_v6  ;;  %v1888_v20 = vsel %vm799_vm2, %v1880_v3, %v1887_v14 }
 0x2b4   : > { %v1456_v15 = vsel %vm1454_vm8, %v1447_v8, 0  ;;  %v1886_v16 = vsel %vm799_vm2, %v1885_v10, %v1868_v0  ;;  %v2025_v17 = vpack.c.bf16 %v1892_v13, %v1892_v13  ;;  %v1475_v18 = vsel %vm1454_vm8, %v1448_v11, 0 }
 0x2b5   : > { %2077 = vmatpush.bf16.xpose.msrb.mxu1 %v2068_v12  ;;  %1465 = vmatpush.bf16.msrb.mxu3 %v1456_v15  ;;  %v2022_v19 = vpack.c.bf16 %v1886_v16, %v1886_v16  ;;  %v2023_v22 = vpack.c.bf16 %v1888_v20, %v1888_v20 }
 0x2b6   : > { %1484 = vmatpush.bf16.msra.mxu0 %v1475_v18  ;;  %v2087_v21 = vsel %vm1162_vm3, %v2025_v17, 0 }
 0x2b7   : > { %v2030_v23 = vsel %vm1162_vm3, %v2022_v19, 0  ;;  %2096 = vmatpush.bf16.xpose.msrb.mxu2 %v2087_v21  ;;  %v2049_v24 = vsel %vm1162_vm3, %v2023_v22, 0 }
 0x2b9   : > { %2039 = vmatpush.bf16.xpose.msra.mxu3 %v2030_v23 }
 0x2ba   : > { %2058 = vmatpush.bf16.xpose.msrb.mxu0 %v2049_v24 }
 0x2f3   : > { %v1281_v25 = vpop.xlane.xlu2 %1280 }
 0x2f4   : > { %3196 = vrcp.f32 %v1281_v25  ;;  %v1326_v33 = vand.u32 2147483648, %v1281_v25  ;;  %v1324_v37 = vand.u32 2147483647, %v1281_v25  ;;  %vm1320_vm10 = vweird.f32 %v1281_v25 }
 0x2f6   : > { %v1327_v41 = vor.u32 1.1754944e-38, %v1326_v33  ;;  %vm1325_vm12 = vcmp.eq.f32.partialorder %v1324_v37, 8.507059e+37  ;;  %v1665_v37 = vrot.slane %v3870_v58, 4 }
 0x2fa   : > { %v3197_v26 = vpop.eup %3196  ;;  %v1275_v53 = vpop.xlane.xlu0 %1274 }
 0x2fb   : > { %v1316_v54 = vmul.f32 %v3197_v26, %v1281_v25  ;;  %v1284_v28 = vpop.xlane.xlu1 %1283  ;;  %3198 = vrcp.f32 %v1275_v53  ;;  %vm1321_vm9 = vweird.f32 %v3197_v26  ;;  %vm1290_vm13 = vweird.f32 %v1275_v53 }
 0x2fc   : > { %3200 = vrcp.f32 %v1284_v28  ;;  %v1278_v29 = vpop.xlane.xlu2 %1277  ;;  %vm1322_vm11 = vmor %vm1320_vm10, %vm1321_vm9  ;;  %v1339_v47 = vand.u32 2147483647, %v1284_v28  ;;  %v1341_v60 = vand.u32 2147483648, %v1284_v28  ;;  %v1296_v61 = vand.u32 2147483648, %v1275_v53 }
 0x2fd   : > { %v1317_v30 = vsub.f32 1.0, %v1316_v54  ;;  %3202 = vrcp.f32 %v1278_v29  ;;  %v1294_v0 = vand.u32 2147483647, %v1275_v53  ;;  %v1311_v2 = vand.u32 2147483648, %v1278_v29 }
 0x2fe   : > { %v1309_v6 = vand.u32 2147483647, %v1278_v29  ;;  %vm1335_vm4 = vweird.f32 %v1284_v28  ;;  %v1342_v8 = vor.u32 1.1754944e-38, %v1341_v60  ;;  %vm1305_vm10 = vweird.f32 %v1278_v29 }
 0x2ff   : > { %v1318_v36 = vmul.f32 %v3197_v26, %v1317_v30  ;;  %vm1295_vm9 = vcmp.eq.f32.partialorder %v1294_v0, 8.507059e+37  ;;  %v1312_v14 = vor.u32 1.1754944e-38, %v1311_v2 }
 0x300   : > { %vm1310_vm1 = vcmp.eq.f32.partialorder %v1309_v6, 8.507059e+37 }
 0x301   : > { %v3199_v38 = vpop.eup %3198  ;;  %v1319_v39 = vadd.f32 %v3197_v26, %v1318_v36 }
 0x302   : > { %v3201_v40 = vpop.eup %3200  ;;  %v1286_v42 = vmul.f32 %v3199_v38, %v1275_v53  ;;  %vm1291_vm14 = vweird.f32 %v3199_v38 }
 0x303   : > { %v3203_v43 = vpop.eup %3202  ;;  %v1323_v44 = vsel %vm1322_vm11, %v3197_v26, %v1319_v39  ;;  %v1331_v45 = vmul.f32 %v3201_v40, %v1284_v28  ;;  %vm1336_vm15 = vweird.f32 %v3201_v40  ;;  %vm1292_vm6 = vmor %vm1290_vm13, %vm1291_vm14  ;;  %vm1340_vm11 = vcmp.eq.f32.partialorder %v1339_v47, 8.507059e+37 }
 0x304   : > { %v1328_v46 = vsel %vm1325_vm12, %v1327_v41, %v1323_v44  ;;  %v1287_v49 = vsub.f32 1.0, %v1286_v42  ;;  %v1301_v50 = vmul.f32 %v3203_v43, %v1278_v29  ;;  %vm1306_vm0 = vweird.f32 %v3203_v43  ;;  %vm1337_vm7 = vmor %vm1335_vm4, %vm1336_vm15  ;;  %v1661_v11 = vpop.permute.xlu2 %1660 }
 0x305   : > { %v1329_v52 = vmul.f32 %v3888_v27, %v1328_v46  ;;  %v1332_v57 = vsub.f32 1.0, %v1331_v45  ;;  %v1297_v27 = vor.u32 1.1754944e-38, %v1296_v61  ;;  %vm1307_vm12 = vmor %vm1305_vm10, %vm1306_vm0  ;;  %v1675_v21 = vrot.slane %v1661_v11, 4 }
 0x306   : > { %v1288_v63 = vmul.f32 %v3199_v38, %v1287_v49  ;;  %v1302_v62 = vsub.f32 1.0, %v1301_v50 }
 0x307   : > { %v1333_v1 = vmul.f32 %v3201_v40, %v1332_v57  ;;  %v1445_v3 = vpack.c.bf16 %v1329_v52, %v1329_v52  ;;  %v1345_v18 = vrot.slane %v1329_v52, 4 }
 0x308   : > { %v1289_v4 = vadd.f32 %v3199_v38, %v1288_v63  ;;  %v1303_v5 = vmul.f32 %v3203_v43, %v1302_v62 }
 0x309   : > { %v1334_v7 = vadd.f32 %v3201_v40, %v1333_v1  ;;  %3010 = vmatmul.msk.bf16.vlgmr.msra.gmra.mxu1 %vm1162_vm3, %v1445_v3 }
 0x30a   : > { %v1293_v9 = vsel %vm1292_vm6, %v3199_v38, %v1289_v4  ;;  %v1304_v10 = vadd.f32 %v3203_v43, %v1303_v5 }
 0x30b   : > { %v1338_v12 = vsel %vm1337_vm7, %v3201_v40, %v1334_v7  ;;  %v1298_v13 = vsel %vm1295_vm9, %v1297_v27, %v1293_v9 }
 0x30c   : > { %v1343_v15 = vsel %vm1340_vm11, %v1342_v8, %v1338_v12  ;;  %v1308_v16 = vsel %vm1307_vm12, %v3203_v43, %v1304_v10  ;;  %v1299_v17 = vmul.f32 %v3892_v31, %v1298_v13 }
 0x30d   : > { %v1344_v19 = vmul.f32 %v3894_v32, %v1343_v15  ;;  %v1313_v20 = vsel %vm1310_vm1, %v1312_v14, %v1308_v16  ;;  %v1655_v22 = vpop.permute.xlu0 %1654 }
 0x30e   : > { %v1314_v23 = vmul.f32 %v3898_v34, %v1313_v20  ;;  %v1677_v24 = vrot.slane %v1655_v22, 4  ;;  %v1347_v25 = vrot.slane %v1299_v17, 4  ;;  %v1676_v26 = vsel %vm799_vm2, %v1675_v21, %v1655_v22 }
 0x30f   : > { %v1443_v53 = vpack.c.bf16 %v1299_v17, %v1299_v17  ;;  %v1446_v54 = vpack.c.bf16 %v1344_v19, %v1344_v19  ;;  %v1346_v28 = vsel %vm799_vm2, %v1345_v18, %v1299_v17  ;;  %v1357_v33 = vrot.slane %v1344_v19, 4 }
 0x310   : > { %v1678_v29 = vsel %vm799_vm2, %v1661_v11, %v1677_v24  ;;  %v1444_v30 = vpack.c.bf16 %v1314_v23, %v1314_v23  ;;  %v1352_v31 = vperm.slane %v1346_v28, %v3770_v35  ;;  %v1348_v34 = vsel %vm799_vm2, %v1329_v52, %v1347_v25 }
 0x311   : > { %v1686_v32 = vperm.slane %v1678_v29, %v3770_v35  ;;  %3008 = vmatmul.msk.bf16.vlgmr.msrb.gmra.mxu3 %vm1162_vm3, %v1443_v53  ;;  %3011 = vmatmul.msk.bf16.vlgmr.msra.gmra.mxu2 %vm1162_vm3, %v1446_v54  ;;  %v1359_v36 = vrot.slane %v1314_v23, 4  ;;  %v1358_v38 = vsel %vm799_vm2, %v1357_v33, %v1314_v23  ;;  %v1356_v40 = vperm.slane %v1348_v34, %v3770_v35 }
 0x312   : > { %3009 = vmatmul.msk.bf16.vlgmr.msra.gmra.mxu0 %vm1162_vm3, %v1444_v30  ;;  %v1371_v39 = vrot.slane %v1352_v31, 4  ;;  %v1682_v41 = vperm.slane %v1676_v26, %v3770_v35  ;;  %v1364_v44 = vperm.slane %v1358_v38, %v3770_v35 }
 0x313   : > { %v1699_v42 = vrot.slane %v1686_v32, 4  ;;  %v1658_v43 = vpop.permute.xlu1 %1657  ;;  %v1360_v45 = vsel %vm799_vm2, %v1344_v19, %v1359_v36  ;;  %v1383_v50 = vrot.slane %v1356_v40, 4 }
 0x314   : > { %v1663_v46 = vrot.slane %v1658_v43, 4  ;;  %v1666_v47 = vsel %vm799_vm2, %v1658_v43, %v1665_v37  ;;  %v1368_v49 = vperm.slane %v1360_v45, %v3770_v35  ;;  %v4028_v57 = vsel %vm799_vm2, %v1364_v44, %v1371_v39 }
 0x315   : > { %v1674_v52 = vperm.slane %v1666_v47, %v3770_v35  ;;  %v1369_v60 = vrot.slane %v1364_v44, 4  ;;  %v1687_v62 = vrot.slane %v1682_v41, 4 }
 0x316   : > { %v1664_v61 = vsel %vm799_vm2, %v1663_v46, %v3870_v58  ;;  %v4033_v63 = vsel %vm799_vm2, %v1368_v49, %v1383_v50  ;;  %v1381_v0 = vrot.slane %v1368_v49, 4 }
 0x317   : > { %v1670_v1 = vperm.slane %v1664_v61, %v3770_v35  ;;  %v1700_v2 = vsel %vm799_vm2, %v1699_v42, %v1674_v52  ;;  %v1701_v3 = vrot.slane %v1674_v52, 4  ;;  %v4039_v5 = vsel %vm799_vm2, %v1369_v60, %v1352_v31 }
 0x318   : > { %v1706_v4 = vperm.slane %v1700_v2, %v3779_v48  ;;  %v4042_v6 = vsel %vm799_vm2, %v1381_v0, %v1356_v40 }
 0x319   : > { %v1688_v58 = vsel %vm799_vm2, %v1687_v62, %v1670_v1  ;;  %v1689_v7 = vrot.slane %v1670_v1, 4  ;;  %v1702_v8 = vsel %vm799_vm2, %v1686_v32, %v1701_v3 }
 0x31a   : > { %v1694_v27 = vperm.slane %v1688_v58, %v3779_v48  ;;  %v1710_v9 = vperm.slane %v1702_v8, %v3779_v48  ;;  %v1715_v12 = vrot.slane %v1706_v4, 4 }
 0x31b   : > { %v1690_v10 = vsel %vm799_vm2, %v1682_v41, %v1689_v7 }
 0x31c   : > { %v1698_v11 = vperm.slane %v1690_v10, %v3779_v48  ;;  %v1717_v13 = vrot.slane %v1710_v9, 4  ;;  %v1711_v14 = vrot.slane %v1694_v27, 4  ;;  %v1716_v21 = vsel %vm799_vm2, 0.0, %v1715_v12 }
 0x31e   : > { %v1713_v15 = vrot.slane %v1698_v11, 4  ;;  %v1718_v16 = vsel %vm799_vm2, 0.0, %v1717_v13  ;;  %v1730_v17 = vsel %vm799_vm2, %v1717_v13, %v1706_v4  ;;  %v1712_v53 = vsel %vm799_vm2, 0.0, %v1711_v14 }
 0x31f   : > { %v1734_v18 = vperm.slane %v1730_v17, %v3770_v35  ;;  %v1735_v19 = vrot.slane %v1718_v16, 4 }
 0x320   : > { %v1714_v20 = vsel %vm799_vm2, 0.0, %v1713_v15  ;;  %v1719_v22 = vsel %vm799_vm2, %v1713_v15, %v1694_v27 }
 0x321   : > { %v1723_v23 = vperm.slane %v1719_v22, %v3770_v35  ;;  %v1724_v24 = vrot.slane %v1714_v20, 4  ;;  %v1736_v25 = vsel %vm799_vm2, %v1735_v19, %v1716_v21  ;;  %v1755_v26 = vrot.slane %v1734_v18, 4  ;;  %v787_v20 = vld [vmem:[#allocation2 + $0x1] sm:$0x1] }
 0x322   : > { %v1740_v54 = vperm.slane %v1736_v25, %v3770_v35  ;;  %vm2013_vm1 = vcmp.gt.f32.partialorder %v787_v20, 0.0 }
 0x323   : > { %v1725_v28 = vsel %vm799_vm2, %v1724_v24, %v1712_v53  ;;  %v1743_v29 = vrot.slane %v1723_v23, 4 }
 0x324   : > { %v1729_v30 = vperm.slane %v1725_v28, %v3770_v35  ;;  %v1753_v31 = vrot.slane %v1740_v54, 4  ;;  %v1756_v33 = vsel %vm799_vm2, %v1740_v54, %v1755_v26 }
 0x325   : > { %v1764_v32 = vperm.slane %v1756_v33, %v3779_v48 }
 0x326   : > { %v1741_v34 = vrot.slane %v1729_v30, 4  ;;  %v1754_v36 = vsel %vm799_vm2, %v1753_v31, %v1734_v18  ;;  %v1744_v37 = vsel %vm799_vm2, %v1729_v30, %v1743_v29 }
 0x327   : > { %v1752_v38 = vperm.slane %v1744_v37, %v3779_v48  ;;  %v1769_v39 = vrot.slane %v1764_v32, 4  ;;  %v1760_v40 = vperm.slane %v1754_v36, %v3779_v48 }
 0x328   : > { %v1742_v41 = vsel %vm799_vm2, %v1741_v34, %v1723_v23 }
 0x329   : > { %v1770_v42 = vsel %vm799_vm2, %v1769_v39, %v1752_v38  ;;  %v1748_v43 = vperm.slane %v1742_v41, %v3779_v48  ;;  %v1765_v44 = vrot.slane %v1760_v40, 4  ;;  %v1771_v45 = vrot.slane %v1752_v38, 4 }
 0x32a   : > { %v2020_v46 = vpack.c.bf16 %v1770_v42, %v1770_v42 }
 0x32b   : > { %v1766_v47 = vsel %vm799_vm2, %v1765_v44, %v1748_v43  ;;  %v1772_v49 = vsel %vm799_vm2, %v1764_v32, %v1771_v45  ;;  %v1767_v50 = vrot.slane %v1748_v43, 4  ;;  %v2014_v32 = vsel %vm2013_vm1, 1, %v3487_v51 }
 0x32c   : > { %3014 = vmatmul.msk.bf16.vlgmr.msrb.gmra.mxu1 %vm1162_vm3, %v2020_v46  ;;  %v2018_v52 = vpack.c.bf16 %v1766_v47, %v1766_v47  ;;  %v2021_v60 = vpack.c.bf16 %v1772_v49, %v1772_v49  ;;  %v2015_v51 = vperm.slane %v2014_v32, 0 }
 0x32d   : > { %v1768_v61 = vsel %vm799_vm2, %v1760_v40, %v1767_v50 }
 0x32e   : > { %3012 = vmatmul.msk.bf16.vlgmr.msra.gmra.mxu3 %vm1162_vm3, %v2018_v52  ;;  %3015 = vmatmul.msk.bf16.vlgmr.msrb.gmra.mxu2 %vm1162_vm3, %v2021_v60  ;;  %v2019_v0 = vpack.c.bf16 %v1768_v61, %v1768_v61  ;;  %vm2016_vm13 = vcmp.eq.s32.totalorder %v2015_v51, 1 }
 0x32f   : > { %vm4116_vm14 = vmor %vm785_vm5, %vm2016_vm13 }
 0x330   : > { %3013 = vmatmul.msk.bf16.vlgmr.msrb.gmra.mxu0 %vm1162_vm3, %v2019_v0 }
 0x386   : > { %v1505_v62 = vpop.f32.mrf.mxu1 }
 0x387   : > { %v1528_v3 = vrot.slane %v1505_v62, 4 }
 0x38e   : > { %v1507_v1 = vpop.f32.mrf.mxu1 }
 0x38f   : > { %v1486_v2 = vpop.f32.mrf.mxu0 }
 0x390   : > { %v1542_v4 = vrot.slane %v1486_v2, 4 }
 0x394   : > { %v1467_v58 = vpop.f32.mrf.mxu3  ;;  %v1524_v7 = vpop.f32.mrf.mxu2 }
 0x395   : > { %v1529_v8 = vsel %vm799_vm2, %v1528_v3, %v1467_v58  ;;  %v1530_v27 = vrot.slane %v1467_v58, 4  ;;  %v1540_v9 = vrot.slane %v1524_v7, 4  ;;  %v1543_v10 = vsel %vm799_vm2, %v1524_v7, %v1542_v4 }
 0x396   : > { %v1535_v11 = vperm.slane %v1529_v8, %v3770_v35  ;;  %v1551_v12 = vperm.slane %v1543_v10, %v3770_v35 }
 0x397   : > { %v1531_v13 = vsel %vm799_vm2, %v1505_v62, %v1530_v27  ;;  %v1541_v14 = vsel %vm799_vm2, %v1540_v9, %v1486_v2  ;;  %v1488_v15 = vpop.f32.mrf.mxu0 }
 0x398   : > { %v1539_v16 = vperm.slane %v1531_v13, %v3770_v35  ;;  %v1554_v17 = vrot.slane %v1535_v11, 4  ;;  %v1547_v18 = vperm.slane %v1541_v14, %v3770_v35  ;;  %v1564_v19 = vrot.slane %v1551_v12, 4 }
 0x39a   : > { %v1566_v21 = vrot.slane %v1539_v16, 4  ;;  %v1552_v22 = vrot.slane %v1547_v18, 4  ;;  %v1555_v23 = vsel %vm799_vm2, %v1547_v18, %v1554_v17  ;;  %v1565_v24 = vsel %vm799_vm2, %v1564_v19, %v1539_v16 }
 0x39b   : > { %v1563_v25 = vperm.slane %v1555_v23, %v3779_v48  ;;  %v1571_v26 = vperm.slane %v1565_v24, %v3779_v48 }
 0x39c   : > { %v1553_v53 = vsel %vm799_vm2, %v1552_v22, %v1535_v11  ;;  %v1567_v54 = vsel %vm799_vm2, %v1551_v12, %v1566_v21  ;;  %v1469_v28 = vpop.f32.mrf.mxu3  ;;  %v1526_v29 = vpop.f32.mrf.mxu2 }
 0x39d   : > { %v1559_v30 = vperm.slane %v1553_v53, %v3779_v48  ;;  %v1575_v31 = vperm.slane %v1567_v54, %v3779_v48  ;;  %v1578_v33 = vrot.slane %v1563_v25, 4  ;;  %v1580_v37 = vrot.slane %v1571_v26, 4 }
 0x39f   : > { %v1576_v34 = vrot.slane %v1559_v30, 4  ;;  %v1579_v36 = vsel %vm799_vm2, 0.0, %v1578_v33  ;;  %v1582_v38 = vrot.slane %v1575_v31, 4  ;;  %v1584_v39 = vsel %vm799_vm2, %v1578_v33, %v1559_v30 }
 0x3a0   : > { %v1589_v40 = vrot.slane %v1579_v36, 4  ;;  %v1588_v43 = vperm.slane %v1584_v39, %v3770_v35  ;;  %v1581_v49 = vsel %vm799_vm2, 0.0, %v1580_v37 }
 0x3a1   : > { %v1577_v41 = vsel %vm799_vm2, 0.0, %v1576_v34  ;;  %v1583_v42 = vsel %vm799_vm2, 0.0, %v1582_v38  ;;  %v1595_v44 = vsel %vm799_vm2, %v1582_v38, %v1571_v26 }
 0x3a2   : > { %v1599_v45 = vperm.slane %v1595_v44, %v3770_v35  ;;  %v1600_v46 = vrot.slane %v1583_v42, 4  ;;  %v1590_v47 = vsel %vm799_vm2, %v1589_v40, %v1577_v41  ;;  %v1608_v52 = vrot.slane %v1588_v43, 4 }
 0x3a3   : > { %v1594_v50 = vperm.slane %v1590_v47, %v3770_v35 }
 0x3a4   : > { %v1601_v60 = vsel %vm799_vm2, %v1600_v46, %v1581_v49  ;;  %v1620_v61 = vrot.slane %v1599_v45, 4 }
 0x3a5   : > { %v1605_v0 = vperm.slane %v1601_v60, %v3770_v35  ;;  %v1609_v62 = vsel %vm799_vm2, %v1594_v50, %v1608_v52  ;;  %v1606_v1 = vrot.slane %v1594_v50, 4 }
 0x3a6   : > { %v1617_v2 = vperm.slane %v1609_v62, %v3779_v48 }
 0x3a7   : > { %v1621_v3 = vsel %vm799_vm2, %v1605_v0, %v1620_v61  ;;  %v1607_v4 = vsel %vm799_vm2, %v1606_v1, %v1588_v43  ;;  %v1618_v58 = vrot.slane %v1605_v0, 4 }
 0x3a8   : > { %v1629_v7 = vperm.slane %v1621_v3, %v3779_v48  ;;  %v1636_v8 = vrot.slane %v1617_v2, 4  ;;  %v1613_v27 = vperm.slane %v1607_v4, %v3779_v48 }
 0x3a9   : > { %v2079_v9 = vpop.f32.mrf.mxu1  ;;  %v1619_v11 = vsel %vm799_vm2, %v1618_v58, %v1599_v45 }
 0x3aa   : > { %v2104_v12 = vmul.f32 3.535534, %v2079_v9  ;;  %v4122_v13 = vsel %vm799_vm2, %v1629_v7, %v1636_v8  ;;  %v1634_v14 = vrot.slane %v1629_v7, 4  ;;  %v1625_v15 = vperm.slane %v1619_v11, %v3779_v48 }
 0x3ab   : > { %v1632_v16 = vrot.slane %v1613_v27, 4  ;;  %v1905_v7 = vrot.slane %v3874_v59, 4 }
 0x3ac   : > { %v2110_v17 = vsel %vm4116_vm14, -1e+09, %v2104_v12  ;;  %v4128_v18 = vsel %vm799_vm2, %v1634_v14, %v1617_v2  ;;  %v1630_v55 = vrot.slane %v1625_v15, 4 }
 0x3ad   : > { %v2060_v56 = vpop.f32.mrf.mxu0  ;;  %v2118_v19 = vsel %vm1162_vm3, %v2110_v17, -inf  ;;  %v4132_v20 = vsel %vm799_vm2, %v1625_v15, %v1632_v16 }
 0x3ae   : > { %v2103_v21 = vmul.f32 3.535534, %v2060_v56  ;;  %2119 = vmax.xlane.f32.xlu2 %v2118_v19  ;;  %v4135_v22 = vsel %vm799_vm2, %v1630_v55, %v1613_v27 }
 0x3b0   : > { %v2109_v23 = vsel %vm4116_vm14, -1e+09, %v2103_v21 }
 0x3b1   : > { %v2041_v24 = vpop.f32.mrf.mxu3  ;;  %v2081_v25 = vpop.f32.mrf.mxu1  ;;  %v2115_v26 = vsel %vm1162_vm3, %v2109_v23, -inf }
 0x3b2   : > { %v2102_v53 = vmul.f32 3.535534, %v2041_v24  ;;  %v2098_v54 = vpop.f32.mrf.mxu2  ;;  %2116 = vmax.xlane.f32.xlu0 %v2115_v26 }
 0x3b3   : > { %v2105_v28 = vmul.f32 3.535534, %v2098_v54 }
 0x3b4   : > { %v2108_v33 = vsel %vm4116_vm14, -1e+09, %v2102_v53 }
 0x3b5   : > { %v2062_v29 = vpop.f32.mrf.mxu0  ;;  %v2111_v30 = vsel %vm4116_vm14, -1e+09, %v2105_v28  ;;  %v2112_v34 = vsel %vm1162_vm3, %v2108_v33, -inf }
 0x3b6   : > { %v2121_v31 = vsel %vm1162_vm3, %v2111_v30, -inf }
 0x3b7   : > { %2122 = vmax.xlane.f32.xlu1 %v2121_v31 }
 0x3b9   : > { %v2043_v32 = vpop.f32.mrf.mxu3 }
 0x3ba   : > { %v2100_v36 = vpop.f32.mrf.mxu2  ;;  %2113 = vmax.xlane.f32.xlu0 %v2112_v34 }
 0x3c6   : > { %1900 = vrot.lane.b32.xlu2 %v3874_v59, %s3483_s2 }
 0x3ce   : > { %1894 = vrot.lane.b32.xlu0 %v3874_v59, %s3484_s3  ;;  %s4575_s3 = sld [smem:[#allocation38_spill]] }
 0x3d0   : > { %1897 = vrot.lane.b32.xlu1 %v3874_v59, %s3482_s1 }
 0x421   : > { %v2120_v37 = vpop.xlane.xlu2 %2119 }
 0x422   : > { %v2126_v38 = vsub.f32 %v2110_v17, %v2120_v37 }
 0x424   : > { %v2132_v39 = vmul.f32 1.442695, %v2126_v38 }
 0x425   : > { %v2117_v40 = vpop.xlane.xlu0 %2116 }
 0x426   : > { %3204 = vpow2.f32 %v2132_v39  ;;  %v2125_v47 = vsub.f32 %v2109_v23, %v2117_v40 }
 0x428   : > { %v2130_v50 = vmul.f32 1.442695, %v2125_v47 }
 0x429   : > { %v1901_v62 = vpop.permute.xlu2 %1900 }
 0x42a   : > { %v2123_v41 = vpop.xlane.xlu1 %2122  ;;  %v1915_v2 = vrot.slane %v1901_v62, 4 }
 0x42b   : > { %v2127_v42 = vsub.f32 %v2111_v30, %v2123_v41 }
 0x42c   : > { %v4152_v43 = vpop.eup %3204 }
 0x42d   : > { %v2134_v44 = vmul.f32 1.442695, %v2127_v42  ;;  %v2114_v45 = vpop.xlane.xlu0 %2113  ;;  %v2142_v46 = vsel %vm1162_vm3, %v4152_v43, 0.0 }
 0x42e   : > { %v2124_v51 = vsub.f32 %v2108_v33, %v2114_v45  ;;  %2143 = vadd.xlane.f32.xlu2 %v2142_v46 }
 0x42f   : > { %3206 = vpow2.f32 %v2134_v44 }
 0x430   : > { %v2128_v49 = vmul.f32 1.442695, %v2124_v51 }
 0x432   : > { %3208 = vpow2.f32 %v2128_v49 }
 0x433   : > { %3210 = vpow2.f32 %v2130_v50 }
 0x435   : > { %v4156_v52 = vpop.eup %3206 }
 0x436   : > { %v2145_v60 = vsel %vm1162_vm3, %v4156_v52, 0.0 }
 0x437   : > { %2146 = vadd.xlane.f32.xlu1 %v2145_v60 }
 0x438   : > { %v4160_v61 = vpop.eup %3208 }
 0x439   : > { %v2136_v0 = vsel %vm1162_vm3, %v4160_v61, 0.0  ;;  %v4164_v1 = vpop.eup %3210 }
 0x43a   : > { %2137 = vadd.xlane.f32.xlu0 %v2136_v0  ;;  %v2139_v8 = vsel %vm1162_vm3, %v4164_v1, 0.0 }
 0x440   : > { %v1895_v3 = vpop.permute.xlu0 %1894 }
 0x441   : > { %v1916_v4 = vsel %vm799_vm2, %v1915_v2, %v1895_v3  ;;  %v1917_v58 = vrot.slane %v1895_v3, 4 }
 0x442   : > { %v1922_v27 = vperm.slane %v1916_v4, %v3770_v35  ;;  %v1898_v9 = vpop.permute.xlu1 %1897  ;;  %2140 = vadd.xlane.f32.xlu0 %v2139_v8 }
 0x443   : > { %v1918_v10 = vsel %vm799_vm2, %v1901_v62, %v1917_v58  ;;  %v1903_v11 = vrot.slane %v1898_v9, 4  ;;  %v1906_v12 = vsel %vm799_vm2, %v1898_v9, %v1905_v7 }
 0x444   : > { %v1926_v14 = vperm.slane %v1918_v10, %v3770_v35  ;;  %v1927_v15 = vrot.slane %v1922_v27, 4  ;;  %v1914_v16 = vperm.slane %v1906_v12, %v3770_v35 }
 0x445   : > { %v1904_v17 = vsel %vm799_vm2, %v1903_v11, %v3874_v59 }
 0x446   : > { %v1939_v55 = vrot.slane %v1926_v14, 4  ;;  %v1910_v56 = vperm.slane %v1904_v17, %v3770_v35  ;;  %v1941_v19 = vrot.slane %v1914_v16, 4 }
 0x448   : > { %v1928_v21 = vsel %vm799_vm2, %v1927_v15, %v1910_v56  ;;  %v1929_v23 = vrot.slane %v1910_v56, 4  ;;  %v1940_v24 = vsel %vm799_vm2, %v1939_v55, %v1914_v16  ;;  %v1942_v25 = vsel %vm799_vm2, %v1926_v14, %v1941_v19 }
 0x449   : > { %v1934_v26 = vperm.slane %v1928_v21, %v3779_v48  ;;  %v1946_v53 = vperm.slane %v1940_v24, %v3779_v48  ;;  %v1950_v54 = vperm.slane %v1942_v25, %v3779_v48 }
 0x44a   : > { %v1930_v28 = vsel %vm799_vm2, %v1922_v27, %v1929_v23 }
 0x44b   : > { %v1938_v59 = vperm.slane %v1930_v28, %v3779_v48  ;;  %v1955_v29 = vrot.slane %v1946_v53, 4  ;;  %v1957_v30 = vrot.slane %v1950_v54, 4  ;;  %v1951_v31 = vrot.slane %v1934_v26, 4 }
 0x44d   : > { %v1953_v33 = vrot.slane %v1938_v59, 4  ;;  %v1956_v32 = vsel %vm799_vm2, 0.0, %v1955_v29  ;;  %v1958_v34 = vsel %vm799_vm2, 0.0, %v1957_v30  ;;  %v1970_v36 = vsel %vm799_vm2, %v1957_v30, %v1946_v53 }
 0x44e   : > { %v1975_v37 = vrot.slane %v1958_v34, 4  ;;  %v1974_v40 = vperm.slane %v1970_v36, %v3770_v35  ;;  %v1952_v45 = vsel %vm799_vm2, 0.0, %v1951_v31 }
 0x44f   : > { %v1954_v38 = vsel %vm799_vm2, 0.0, %v1953_v33  ;;  %v1959_v39 = vsel %vm799_vm2, %v1953_v33, %v1934_v26 }
 0x450   : > { %v1964_v41 = vrot.slane %v1954_v38, 4  ;;  %v1976_v42 = vsel %vm799_vm2, %v1975_v37, %v1956_v32  ;;  %v1963_v44 = vperm.slane %v1959_v39, %v3770_v35  ;;  %v1995_v51 = vrot.slane %v1974_v40, 4 }
 0x451   : > { %v1980_v46 = vperm.slane %v1976_v42, %v3770_v35 }
 0x452   : > { %v1965_v47 = vsel %vm799_vm2, %v1964_v41, %v1952_v45  ;;  %v1983_v49 = vrot.slane %v1963_v44, 4 }
 0x453   : > { %v1993_v50 = vrot.slane %v1980_v46, 4  ;;  %v1969_v60 = vperm.slane %v1965_v47, %v3770_v35  ;;  %v1996_v0 = vsel %vm799_vm2, %v1980_v46, %v1995_v51 }
 0x454   : > { %v2004_v62 = vperm.slane %v1996_v0, %v3779_v48 }
 0x455   : > { %v1984_v2 = vsel %vm799_vm2, %v1969_v60, %v1983_v49  ;;  %v1981_v3 = vrot.slane %v1969_v60, 4  ;;  %v1994_v4 = vsel %vm799_vm2, %v1993_v50, %v1974_v40 }
 0x456   : > { %v1992_v58 = vperm.slane %v1984_v2, %v3779_v48  ;;  %v2009_v7 = vrot.slane %v2004_v62, 4  ;;  %v2000_v8 = vperm.slane %v1994_v4, %v3779_v48 }
 0x457   : > { %v1982_v27 = vsel %vm799_vm2, %v1981_v3, %v1963_v44 }
 0x458   : > { %v2010_v9 = vsel %vm799_vm2, %v2009_v7, %v1992_v58  ;;  %v1988_v10 = vperm.slane %v1982_v27, %v3779_v48  ;;  %v2005_v11 = vrot.slane %v2000_v8, 4  ;;  %v2011_v12 = vrot.slane %v1992_v58, 4 }
 0x459   : > { %v2307_v14 = vpack.c.bf16 %v2010_v9, %v2010_v9 }
 0x45a   : > { %v2006_v15 = vsel %vm799_vm2, %v2005_v11, %v1988_v10  ;;  %v2012_v16 = vsel %vm799_vm2, %v2004_v62, %v2011_v12  ;;  %v2007_v17 = vrot.slane %v1988_v10, 4 }
 0x45b   : > { %v2351_v55 = vsel %vm1454_vm8, %v2307_v14, 0  ;;  %v2305_v56 = vpack.c.bf16 %v2006_v15, %v2006_v15  ;;  %v2308_v19 = vpack.c.bf16 %v2012_v16, %v2012_v16 }
 0x45c   : > { %2360 = vmatpush.bf16.msra.mxu1 %v2351_v55  ;;  %v2008_v21 = vsel %vm799_vm2, %v2000_v8, %v2007_v17 }
 0x45d   : > { %v2313_v23 = vsel %vm1454_vm8, %v2305_v56, 0  ;;  %v2370_v24 = vsel %vm1454_vm8, %v2308_v19, 0  ;;  %v2306_v25 = vpack.c.bf16 %v2008_v21, %v2008_v21 }
 0x45e   : > { %2322 = vmatpush.bf16.msrb.mxu3 %v2313_v23  ;;  %2379 = vmatpush.bf16.msra.mxu2 %v2370_v24 }
 0x45f   : > { %v2332_v26 = vsel %vm1454_vm8, %v2306_v25, 0 }
 0x460   : > { %2341 = vmatpush.bf16.msra.mxu0 %v2332_v26 }
 0x4a1   : > { %v2144_v53 = vpop.xlane.xlu2 %2143 }
 0x4a2   : > { %3212 = vrcp.f32 %v2144_v53  ;;  %v2189_v30 = vand.u32 2147483648, %v2144_v53  ;;  %v2187_v33 = vand.u32 2147483647, %v2144_v53  ;;  %vm2183_vm15 = vweird.f32 %v2144_v53 }
 0x4a4   : > { %v2190_v36 = vor.u32 1.1754944e-38, %v2189_v30  ;;  %vm2188_vm8 = vcmp.eq.f32.partialorder %v2187_v33, 8.507059e+37 }
 0x4a8   : > { %v3213_v54 = vpop.eup %3212 }
 0x4a9   : > { %v2179_v28 = vmul.f32 %v3213_v54, %v2144_v53  ;;  %vm2184_vm5 = vweird.f32 %v3213_v54 }
 0x4aa   : > { %v2147_v59 = vpop.xlane.xlu1 %2146  ;;  %vm2185_vm0 = vmor %vm2183_vm15, %vm2184_vm5 }
 0x4ab   : > { %v2180_v29 = vsub.f32 1.0, %v2179_v28  ;;  %3214 = vrcp.f32 %v2147_v59  ;;  %v2204_v45 = vand.u32 2147483648, %v2147_v59  ;;  %v2202_v50 = vand.u32 2147483647, %v2147_v59 }
 0x4ac   : > { %vm2198_vm6 = vweird.f32 %v2147_v59 }
 0x4ad   : > { %v2181_v31 = vmul.f32 %v3213_v54, %v2180_v29  ;;  %v2138_v32 = vpop.xlane.xlu0 %2137  ;;  %v2205_v2 = vor.u32 1.1754944e-38, %v2204_v45  ;;  %vm2203_vm10 = vcmp.eq.f32.partialorder %v2202_v50, 8.507059e+37 }
 0x4ae   : > { %3216 = vrcp.f32 %v2138_v32  ;;  %v2159_v62 = vand.u32 2147483648, %v2138_v32  ;;  %vm2153_vm11 = vweird.f32 %v2138_v32 }
 0x4af   : > { %v2182_v34 = vadd.f32 %v3213_v54, %v2181_v31 }
 0x4b0   : > { %v2160_v9 = vor.u32 1.1754944e-38, %v2159_v62 }
 0x4b1   : > { %v3215_v37 = vpop.eup %3214  ;;  %v2186_v38 = vsel %vm2185_vm0, %v3213_v54, %v2182_v34  ;;  %vm1430_vm0 = vcmask 130048  }
 0x4b2   : > { %v2191_v39 = vsel %vm2188_vm8, %v2190_v36, %v2186_v38  ;;  %v2194_v40 = vmul.f32 %v3215_v37, %v2147_v59  ;;  %vm2199_vm4 = vweird.f32 %v3215_v37  ;;  %vm1432_vm8 = vcmask 195584  }
 0x4b3   : > { %v2192_v41 = vmul.f32 %v4152_v43, %v2191_v39  ;;  %vm2200_vm7 = vmor %vm2198_vm6, %vm2199_vm4  ;;  %v2157_v43 = vand.u32 2147483647, %v2138_v32  ;;  %vm4561_vm4 = vcmask 261120  }
 0x4b4   : > { %v3217_v42 = vpop.eup %3216  ;;  %v2195_v44 = vsub.f32 1.0, %v2194_v40  ;;  %vm4562_vm6 = vmmov %vm4561_vm4 }
 0x4b5   : > { %v2149_v46 = vmul.f32 %v3217_v42, %v2138_v32  ;;  %v2141_v51 = vpop.xlane.xlu0 %2140  ;;  %v2303_v47 = vpack.c.bf16 %v2192_v41, %v2192_v41  ;;  %vm2154_vm9 = vweird.f32 %v3217_v42  ;;  %vm2158_vm1 = vcmp.eq.f32.partialorder %v2157_v43, 8.507059e+37 }
 0x4b6   : > { %v2196_v49 = vmul.f32 %v3215_v37, %v2195_v44  ;;  %3218 = vrcp.f32 %v2141_v51  ;;  %vm2155_vm12 = vmor %vm2153_vm11, %vm2154_vm9  ;;  %v2208_v17 = vrot.slane %v2192_v41, 4  ;;  %v2172_v55 = vand.u32 2147483647, %v2141_v51 }
 0x4b7   : > { %v2150_v60 = vsub.f32 1.0, %v2149_v46  ;;  %3019 = vmatmul.msk.bf16.vlgmr.msra.gmra.mxu1 %vm1162_vm3, %v2303_v47  ;;  %v2174_v56 = vand.u32 2147483648, %v2141_v51  ;;  %vm2168_vm14 = vweird.f32 %v2141_v51  ;;  %vm4565_vm11 = vmmov %vm4561_vm4 }
 0x4b8   : > { %v2197_v0 = vadd.f32 %v3215_v37, %v2196_v49  ;;  %vm2173_vm15 = vcmp.eq.f32.partialorder %v2172_v55, 8.507059e+37 }
 0x4b9   : > { %v2151_v3 = vmul.f32 %v3217_v42, %v2150_v60 }
 0x4ba   : > { %v2201_v4 = vsel %vm2200_vm7, %v3215_v37, %v2197_v0  ;;  %vm4563_vm7 = vmmov %vm4561_vm4 }
 0x4bb   : > { %v2206_v58 = vsel %vm2203_vm10, %v2205_v2, %v2201_v4  ;;  %v2152_v7 = vadd.f32 %v3217_v42, %v2151_v3  ;;  %vm4564_vm10 = vmmov %vm4561_vm4 }
 0x4bc   : > { %v3219_v8 = vpop.eup %3218  ;;  %v2207_v27 = vmul.f32 %v4156_v52, %v2206_v58 }
 0x4bd   : > { %v2156_v10 = vsel %vm2155_vm12, %v3217_v42, %v2152_v7  ;;  %v2164_v11 = vmul.f32 %v3219_v8, %v2141_v51  ;;  %vm2169_vm13 = vweird.f32 %v3219_v8 }
 0x4be   : > { %v2161_v12 = vsel %vm2158_vm1, %v2160_v9, %v2156_v10  ;;  %v2304_v14 = vpack.c.bf16 %v2207_v27, %v2207_v27  ;;  %vm2170_vm5 = vmor %vm2168_vm14, %vm2169_vm13  ;;  %v2220_v28 = vrot.slane %v2207_v27, 4 }
 0x4bf   : > { %v2162_v15 = vmul.f32 %v4160_v61, %v2161_v12  ;;  %v2165_v16 = vsub.f32 1.0, %v2164_v11  ;;  %v2175_v61 = vor.u32 1.1754944e-38, %v2174_v56 }
 0x4c0   : > { %3020 = vmatmul.msk.bf16.vlgmr.msra.gmra.mxu2 %vm1162_vm3, %v2304_v14 }
 0x4c1   : > { %v2166_v19 = vmul.f32 %v3219_v8, %v2165_v16  ;;  %v2301_v21 = vpack.c.bf16 %v2162_v15, %v2162_v15  ;;  %v2209_v52 = vsel %vm799_vm2, %v2208_v17, %v2162_v15  ;;  %v2210_v23 = vrot.slane %v2162_v15, 4 }
 0x4c2   : > { %v2215_v54 = vperm.slane %v2209_v52, %v3770_v35 }
 0x4c3   : > { %v2167_v24 = vadd.f32 %v3219_v8, %v2166_v19  ;;  %3017 = vmatmul.msk.bf16.vlgmr.msrb.gmra.mxu3 %vm1162_vm3, %v2301_v21  ;;  %v2211_v25 = vsel %vm799_vm2, %v2192_v41, %v2210_v23 }
 0x4c4   : > { %v2219_v29 = vperm.slane %v2211_v25, %v3770_v35  ;;  %v2234_v34 = vrot.slane %v2215_v54, 4 }
 0x4c5   : > { %v2171_v26 = vsel %vm2170_vm5, %v3219_v8, %v2167_v24 }
 0x4c6   : > { %v2176_v53 = vsel %vm2173_vm15, %v2175_v61, %v2171_v26 }
 0x4c7   : > { %v2177_v59 = vmul.f32 %v4164_v1, %v2176_v53  ;;  %v2246_v1 = vrot.slane %v2219_v29, 4 }
 0x4c9   : > { %v2222_v30 = vrot.slane %v2177_v59, 4  ;;  %v2302_v31 = vpack.c.bf16 %v2177_v59, %v2177_v59  ;;  %v2221_v33 = vsel %vm799_vm2, %v2220_v28, %v2177_v59 }
 0x4ca   : > { %v2227_v32 = vperm.slane %v2221_v33, %v3770_v35 }
 0x4cb   : > { %3018 = vmatmul.msk.bf16.vlgmr.msra.gmra.mxu0 %vm1162_vm3, %v2302_v31  ;;  %v2223_v36 = vsel %vm799_vm2, %v2207_v27, %v2222_v30 }
 0x4cc   : > { %v2232_v37 = vrot.slane %v2227_v32, 4  ;;  %v2231_v38 = vperm.slane %v2223_v36, %v3770_v35  ;;  %v4231_v39 = vsel %vm799_vm2, %v2227_v32, %v2234_v34 }
 0x4ce   : > { %v4234_v40 = vsel %vm799_vm2, %v2232_v37, %v2215_v54  ;;  %v2244_v41 = vrot.slane %v2231_v38, 4  ;;  %v4237_v42 = vsel %vm799_vm2, %v2231_v38, %v2246_v1 }
 0x4d0   : > { %v4240_v44 = vsel %vm799_vm2, %v2244_v41, %v2219_v29 }
 0x534   : > { %v2362_v45 = vpop.f32.mrf.mxu1 }
 0x535   : > { %v2385_v47 = vrot.slane %v2362_v45, 4 }
 0x53c   : > { %v2364_v46 = vpop.f32.mrf.mxu1 }
 0x543   : > { %v2381_v51 = vpop.f32.mrf.mxu2 }
 0x544   : > { %v2397_v50 = vrot.slane %v2381_v51, 4 }
 0x546   : > { %v2324_v49 = vpop.f32.mrf.mxu3 }
 0x547   : > { %v2386_v60 = vsel %vm799_vm2, %v2385_v47, %v2324_v49  ;;  %v2387_v0 = vrot.slane %v2324_v49, 4 }
 0x548   : > { %v2392_v62 = vperm.slane %v2386_v60, %v3770_v35  ;;  %v2343_v2 = vpop.f32.mrf.mxu0 }
 0x549   : > { %v2388_v3 = vsel %vm799_vm2, %v2362_v45, %v2387_v0  ;;  %v2398_v43 = vsel %vm799_vm2, %v2397_v50, %v2343_v2  ;;  %v2399_v4 = vrot.slane %v2343_v2, 4 }
 0x54a   : > { %v2396_v58 = vperm.slane %v2388_v3, %v3770_v35  ;;  %v2411_v7 = vrot.slane %v2392_v62, 4  ;;  %v2404_v8 = vperm.slane %v2398_v43, %v3770_v35 }
 0x54b   : > { %v2400_v27 = vsel %vm799_vm2, %v2381_v51, %v2399_v4  ;;  %v2383_v9 = vpop.f32.mrf.mxu2 }
 0x54c   : > { %v2423_v10 = vrot.slane %v2396_v58, 4  ;;  %v2408_v11 = vperm.slane %v2400_v27, %v3770_v35  ;;  %v2409_v12 = vrot.slane %v2404_v8, 4  ;;  %v2412_v14 = vsel %vm799_vm2, %v2404_v8, %v2411_v7 }
 0x54d   : > { %v2420_v15 = vperm.slane %v2412_v14, %v3779_v48 }
 0x54e   : > { %v2410_v16 = vsel %vm799_vm2, %v2409_v12, %v2392_v62  ;;  %v2421_v17 = vrot.slane %v2408_v11, 4  ;;  %v2424_v55 = vsel %vm799_vm2, %v2408_v11, %v2423_v10  ;;  %v2326_v56 = vpop.f32.mrf.mxu3 }
 0x54f   : > { %v2416_v19 = vperm.slane %v2410_v16, %v3779_v48  ;;  %v2432_v21 = vperm.slane %v2424_v55, %v3779_v48  ;;  %v2435_v52 = vrot.slane %v2420_v15, 4  ;;  %v2514_v15 = vld [vmem:[%s3700_s25 + $0x18] sm:$0xff]  ;;  %v2512_v55 = vld [vmem:[%s3700_s25 + $0x8] sm:$0xff] }
 0x550   : > { %v2422_v23 = vsel %vm799_vm2, %v2421_v17, %v2396_v58  ;;  %v2345_v24 = vpop.f32.mrf.mxu0  ;;  %v2511_v17 = vld [vmem:[%s3700_s25] sm:$0xff] }
 0x551   : > { %v2428_v25 = vperm.slane %v2422_v23, %v3779_v48  ;;  %v2433_v61 = vrot.slane %v2416_v19, 4  ;;  %v2436_v26 = vsel %vm799_vm2, 0.0, %v2435_v52  ;;  %v2439_v53 = vrot.slane %v2432_v21, 4 }
 0x552   : > { %v2441_v54 = vsel %vm799_vm2, %v2435_v52, %v2416_v19  ;;  %v2446_v28 = vrot.slane %v2436_v26, 4  ;;  %v2515_v56 = vpack.c.bf16 %v2512_v55, %v2511_v17  ;;  %v2599_v55 = vld [vmem:[%s3747_s21 + $0x8] sm:$0xff] }
 0x553   : > { %v2434_v59 = vsel %vm799_vm2, 0.0, %v2433_v61  ;;  %v2437_v29 = vrot.slane %v2428_v25, 4  ;;  %v2440_v30 = vsel %vm799_vm2, 0.0, %v2439_v53  ;;  %v2445_v31 = vperm.slane %v2441_v54, %v3770_v35 }
 0x554   : > { %v2447_v33 = vsel %vm799_vm2, %v2446_v28, %v2434_v59  ;;  %v2452_v32 = vsel %vm799_vm2, %v2439_v53, %v2428_v25  ;;  %v2457_v34 = vrot.slane %v2440_v30, 4 }
 0x555   : > { %v2451_v36 = vperm.slane %v2447_v33, %v3770_v35  ;;  %v2465_v37 = vrot.slane %v2445_v31, 4  ;;  %v2438_v38 = vsel %vm799_vm2, 0.0, %v2437_v29  ;;  %v2456_v1 = vperm.slane %v2452_v32, %v3770_v35  ;;  %v3230_v33 = vld [vmem:[#allocation9] sm:$0xff] }
 0x556   : > { %v2458_v41 = vsel %vm799_vm2, %v2457_v34, %v2438_v38 }
 0x557   : > { %v2462_v45 = vperm.slane %v2458_v41, %v3770_v35  ;;  %v2466_v46 = vsel %vm799_vm2, %v2451_v36, %v2465_v37  ;;  %v2477_v51 = vrot.slane %v2456_v1, 4  ;;  %v2463_v47 = vrot.slane %v2451_v36, 4  ;;  %v3231_v36 = vld [vmem:[#allocation9 + $0x8] sm:$0xff] }
 0x558   : > { %v2474_v49 = vperm.slane %v2466_v46, %v3779_v48 }
 0x559   : > { %v2478_v50 = vsel %vm799_vm2, %v2462_v45, %v2477_v51  ;;  %v2464_v60 = vsel %vm799_vm2, %v2463_v47, %v2445_v31  ;;  %v2475_v0 = vrot.slane %v2462_v45, 4 }
 0x55a   : > { %v2486_v62 = vperm.slane %v2478_v50, %v3779_v48  ;;  %v2493_v2 = vrot.slane %v2474_v49, 4  ;;  %v2470_v3 = vperm.slane %v2464_v60, %v3779_v48 }
 0x55b   : > { %v2476_v43 = vsel %vm799_vm2, %v2475_v0, %v2456_v1  ;;  %v3491_v1 = vmov 32.0  }
 0x55c   : > { %v2494_v35 = vsel %vm799_vm2, %v2486_v62, %v2493_v2  ;;  %v2491_v4 = vrot.slane %v2486_v62, 4  ;;  %v2482_v58 = vperm.slane %v2476_v43, %v3779_v48  ;;  %v2489_v7 = vrot.slane %v2470_v3, 4 }
 0x55d   : > { %v3179_v8 = vpack.i.bf16 %v2494_v35, %v4122_v13  ;;  %v2513_v13 = vld [vmem:[%s3700_s25 + $0x10] sm:$0xff]  ;;  %3220 = vrcp.f32 %v3491_v1  ;;  %s3493_s25 = smov 48  }
 0x55e   : > { %v2492_v27 = vsel %vm799_vm2, %v2491_v4, %v2474_v49  ;;  %v2487_v9 = vrot.slane %v2482_v58, 4  ;;  %v2490_v10 = vsel %vm799_vm2, %v2482_v58, %v2489_v7  ;;  %v2516_v16 = vpack.c.bf16 %v2514_v15, %v2513_v13  ;;  %v2601_v15 = vld [vmem:[%s3747_s21 + $0x18] sm:$0xff] }
 0x55f   : > { %3180 = vrot.lane.b32.xlu2 %v3179_v8, %s3488_s26  ;;  %v3174_v11 = vpack.i.bf16 %v2492_v27, %v4128_v18  ;;  %v3169_v12 = vpack.i.bf16 %v2490_v10, %v4132_v20  ;;  %v4310_v7 = vperm.slane %v4234_v40, %v3779_v48  ;;  %v4324_v40 = vperm.slane %v4240_v44, %v3779_v48  ;;  %v2600_v44 = vld [vmem:[%s3747_s21 + $0x10] sm:$0xff] }
 0x560   : > { %v2488_v14 = vsel %vm799_vm2, %v2487_v9, %v2470_v3  ;;  %2526 = vmatpush.bf16.msra.mxu3 %v2516_v16  ;;  %v4316_v9 = vperm.slane %v4028_v57, %v3779_v48  ;;  %v4330_v57 = vperm.slane %v4033_v63, %v3779_v48  ;;  %v2598_v16 = vld [vmem:[%s3747_s21] sm:$0xff]  ;;  %v2603_v17 = vpack.c.bf16 %v2601_v15, %v2600_v44 }
 0x561   : > { %3175 = vrot.lane.b32.xlu0 %v3174_v11, %s3489_s30  ;;  %3170 = vrot.lane.b32.xlu1 %v3169_v12, %s3490_s14  ;;  %v2256_v8 = vrot.slane %v4310_v7, 4  ;;  %v4363_v15 = vperm.slane %v4039_v5, %v3779_v48  ;;  %v2260_v5 = vrot.slane %v4324_v40, 4 }
 0x562   : > { %v1395_v10 = vrot.slane %v4316_v9, 4  ;;  %2613 = vmatpush.bf16.msrb.mxu0 %v2603_v17 }
 0x563   : > { %v3221_v41 = vpop.eup %3220  ;;  %v2257_v27 = vsel %vm799_vm2, 0.0, %v2256_v8 }
 0x564   : > { %2527 = vmatpush.bf16.msra.mxu3 %v2515_v56  ;;  %v2543_v45 = vmul.f32 32.0, %v3221_v41  ;;  %vm2547_vm9 = vweird.f32 %v3221_v41  ;;  %v1396_v11 = vsel %vm799_vm2, 0.0, %v1395_v10  ;;  %v2602_v56 = vpack.c.bf16 %v2599_v55, %v2598_v16 }
 0x565   : > { %v1393_v16 = vrot.slane %v4363_v15, 4  ;;  %v1388_v55 = vperm.slane %v4042_v6, %v3779_v48 }
 0x566   : > { %v2544_v46 = vsub.f32 1.0, %v2543_v45  ;;  %2614 = vmatpush.bf16.msrb.mxu0 %v2602_v56  ;;  %v2243_v56 = vperm.slane %v4231_v39, %v3779_v48  ;;  %v2255_v39 = vperm.slane %v4237_v42, %v3779_v48 }
 0x567   : > { %v1394_v17 = vsel %vm799_vm2, 0.0, %v1393_v16 }
 0x568   : > { %v2545_v51 = vmul.f32 %v3221_v41, %v2544_v46 }
 0x56a   : > { %v2546_v47 = vadd.f32 %v3221_v41, %v2545_v51  ;;  %v2628_v51 = vld [vmem:[%s3741_s11 + $0x20] sm:$0xff] }
 0x56c   : > { %v4302_v49 = vsel %vm2547_vm9, %v3221_v41, %v2546_v47  ;;  %v2629_v47 = vld [vmem:[%s3741_s11 + $0x28] sm:$0xff]  ;;  %vm4569_vm9 = vmmov %vm4561_vm4 }
 0x5b9   : > { %v3181_v19 = vpop.permute.xlu2 %3180 }
 0x5ba   : > { %v3183_v25 = vunpack.i.h.bf16 %v3181_v19  ;;  %v3182_v61 = vunpack.i.l.bf16 %v3181_v19  ;;  %v2630_v19 = vld [vmem:[%s3741_s11 + $0x30] sm:$0xff] }
 0x5d3   : > { %v3176_v18 = vpop.permute.xlu0 %3175  ;;  %v3171_v20 = vpop.permute.xlu1 %3170 }
 0x5d4   : > { %v3178_v21 = vunpack.i.h.bf16 %v3176_v18  ;;  %v3177_v52 = vunpack.i.l.bf16 %v3176_v18  ;;  %v3173_v23 = vunpack.i.h.bf16 %v3171_v20  ;;  %v3172_v24 = vunpack.i.l.bf16 %v3171_v20  ;;  %v2631_v18 = vld [vmem:[%s3741_s11 + $0x38] sm:$0xff] }
 0x5d5   : > { %v2635_v20 = vpack.c.bf16 %v2631_v18, %v2630_v19  ;;  %v2258_v19 = vrot.slane %v2243_v56, 4  ;;  %v2261_v18 = vsel %vm799_vm2, 0.0, %v2260_v5 }
 0x5d6   : > { %v1650_v26 = vsel %vm1162_vm3, %v4135_v22, %v3172_v24  ;;  %v2507_v53 = vsel %vm1162_vm3, %v2488_v14, %v3173_v23 }
 0x5d7   : > { %v1651_v54 = vsel %vm1430_vm0, %v1650_v26, %v3177_v52  ;;  %v2508_v28 = vsel %vm1430_vm0, %v2507_v53, %v3178_v21  ;;  %2644 = vmatpush.bf16.msrb.mxu1 %v2635_v20 }
 0x5d8   : > { %v1652_v59 = vsel %vm1432_vm8, %v1651_v54, %v3182_v61  ;;  %v2509_v29 = vsel %vm1432_vm8, %v2508_v28, %v3183_v25 }
 0x5d9   : > { %v2510_v30 = vpack.c.bf16 %v2509_v29, %v1652_v59 }
 0x5db   : > { %3021 = vmatmul.msk.bf16.vlgmr.msra.gmra.mxu3 %vm4561_vm4, %v2510_v30 }
 0x65e   : > { %v2529_v31 = vpop.f32.mrf.mxu3 }
 0x65f   : > { %v2530_v32 = vadd.f32 %v3230_v33, %v2529_v31  ;;  %v3184_v33 = vld [vmem:[%s4566_s18] ss:$0 sm:$0xff] }
 0x661   : > { %v2536_v34 = vsel %vm4562_vm6, %v2530_v32, 0.0  ;;  %vm2636_vm6 = vcmask 523264  }
 0x662   : > { %2537 = vadd.xlane.f32.xlu0 %v2536_v34 }
 0x666   : > { %v2531_v22 = vpop.f32.mrf.mxu3 }
 0x667   : > { %v2532_v37 = vadd.f32 %v3231_v36, %v2531_v22  ;;  %v3185_v36 = vld [vmem:[%s690_s8] ss:$0 sm:$0xff]  ;;  %s3494_s8 = smov 40  }
 0x669   : > { %v2539_v38 = vsel %vm4563_vm7, %v2532_v37, 0.0  ;;  %vm4568_vm7 = vmmov %vm4561_vm4 }
 0x66a   : > { %2540 = vadd.xlane.f32.xlu1 %v2539_v38 }
 0x6d5   : > { %v2538_v50 = vpop.xlane.xlu0 %2537 }
 0x6d6   : > { %v2549_v60 = vmul.f32 %v4302_v49, %v2538_v50  ;;  %v2626_v50 = vld [vmem:[%s3741_s11 + $0x10] sm:$0xff] }
 0x6d8   : > { %v2551_v0 = vsub.f32 %v2530_v32, %v2549_v60  ;;  %v2634_v60 = vpack.c.bf16 %v2629_v47, %v2628_v51 }
 0x6da   : > { %v2553_v62 = vmul.f32 %v2551_v0, %v2551_v0  ;;  %2645 = vmatpush.bf16.msrb.mxu1 %v2634_v60 }
 0x6dc   : > { %v2555_v2 = vsel %vm4564_vm10, %v2553_v62, 0.0  ;;  %vm4570_vm10 = vmmov %vm4561_vm4 }
 0x6dd   : > { %v2541_v3 = vpop.xlane.xlu1 %2540  ;;  %2556 = vadd.xlane.f32.xlu2 %v2555_v2  ;;  %v2624_v2 = vld [vmem:[%s3741_s11] sm:$0xff] }
 0x6de   : > { %v2550_v43 = vmul.f32 %v4302_v49, %v2541_v3  ;;  %v2625_v3 = vld [vmem:[%s3741_s11 + $0x8] sm:$0xff] }
 0x6e0   : > { %v2552_v35 = vsub.f32 %v2532_v37, %v2550_v43  ;;  %v2632_v43 = vpack.c.bf16 %v2625_v3, %v2624_v2 }
 0x6e2   : > { %v2554_v4 = vmul.f32 %v2552_v35, %v2552_v35 }
 0x6e4   : > { %v2558_v58 = vsel %vm4565_vm11, %v2554_v4, 0.0  ;;  %vm4571_vm11 = vmmov %vm4561_vm4 }
 0x6e5   : > { %2559 = vadd.xlane.f32.xlu0 %v2558_v58 }
 0x6f5   : > { %2265 = vrot.lane.b32.xlu2 %v2257_v27, %s3490_s14 }
 0x6fd   : > { %1410 = vrot.lane.b32.xlu2 %v1396_v11, %s3488_s26 }
 0x705   : > { %2277 = vrot.lane.b32.xlu2 %v4324_v40, %s3492_s10 }
 0x70d   : > { %1422 = vrot.lane.b32.xlu2 %v4330_v57, %s3493_s25 }
 0x750   : > { %v2557_v12 = vpop.xlane.xlu2 %2556 }
 0x751   : > { %v2561_v14 = vmul.f32 %v2557_v12, %v4302_v49 }
 0x753   : > { %v2563_v13 = vadd.f32 1e-05, %v2561_v14 }
 0x755   : > { %3222 = vrsqrt.f32 %v2563_v13  ;;  %vm2571_vm1 = vweird.f32 %v2563_v13 }
 0x758   : > { %v2560_v63 = vpop.xlane.xlu0 %2559 }
 0x759   : > { %v2562_v21 = vmul.f32 %v2560_v63, %v4302_v49  ;;  %v1397_v63 = vrot.slane %v1388_v55, 4 }
 0x75b   : > { %v3223_v52 = vpop.eup %3222  ;;  %v2564_v23 = vadd.f32 1e-05, %v2562_v21  ;;  %v1398_v6 = vsel %vm799_vm2, 0.0, %v1397_v63 }
 0x75c   : > { %v2566_v24 = vmul.f32 %v3223_v52, %v2563_v13  ;;  %vm2572_vm12 = vweird.f32 %v3223_v52 }
 0x75d   : > { %3224 = vrsqrt.f32 %v2564_v23  ;;  %vm2573_vm13 = vmor %vm2571_vm1, %vm2572_vm12  ;;  %vm2581_vm5 = vweird.f32 %v2564_v23  ;;  %vm1435_vm12 = vcmask 326656   ;;  %vm1439_vm1 = vcmask 457728  }
 0x75e   : > { %v2567_v25 = vmul.f32 %v3223_v52, %v2566_v24 }
 0x760   : > { %v2568_v61 = vmul.f32 0.5, %v2567_v25 }
 0x762   : > { %v2569_v26 = vsub.f32 1.5, %v2568_v61 }
 0x763   : > { %v3225_v53 = vpop.eup %3224 }
 0x764   : > { %v2570_v54 = vmul.f32 %v3223_v52, %v2569_v26  ;;  %v2576_v28 = vmul.f32 %v3225_v53, %v2564_v23  ;;  %vm2582_vm14 = vweird.f32 %v3225_v53  ;;  %v2262_v26 = vrot.slane %v2255_v39, 4 }
 0x765   : > { %vm2583_vm15 = vmor %vm2581_vm5, %vm2582_vm14  ;;  %vm1441_vm14 = vcmask 519168  }
 0x766   : > { %v2577_v59 = vmul.f32 %v3225_v53, %v2576_v28  ;;  %v2574_v29 = vsel %vm2573_vm13, %v3223_v52, %v2570_v54  ;;  %v1399_v54 = vrot.slane %v4330_v57, 4  ;;  %vm1437_vm13 = vcmask 392192  }
 0x767   : > { %v2585_v32 = vmul.f32 %v2574_v29, %v2551_v0  ;;  %v2627_v0 = vld [vmem:[%s3741_s11 + $0x18] sm:$0xff] }
 0x768   : > { %v2578_v30 = vmul.f32 0.5, %v2577_v59  ;;  %v2633_v62 = vpack.c.bf16 %v2627_v0, %v2626_v50  ;;  %v1400_v28 = vsel %vm799_vm2, 0.0, %v1399_v54  ;;  %v2266_v59 = vpop.permute.xlu2 %2265 }
 0x769   : > { %v2590_v37 = vmul.f32 %v3184_v33, %v2585_v32 }
 0x76a   : > { %v2579_v31 = vsub.f32 1.5, %v2578_v30  ;;  %2646 = vmatpush.bf16.msrb.mxu1 %v2633_v62 }
 0x76b   : > { %v2595_v41 = vadd.f32 %v3185_v36, %v2590_v37 }
 0x76c   : > { %v2580_v34 = vmul.f32 %v3225_v53, %v2579_v31 }
 0x76e   : > { %v2584_v22 = vsel %vm2583_vm15, %v3225_v53, %v2580_v34  ;;  %2647 = vmatpush.bf16.msrb.mxu1 %v2632_v43  ;;  %v2263_v53 = vsel %vm799_vm2, 0.0, %v2262_v26 }
 0x76f   : > { %v2586_v38 = vmul.f32 %v2584_v22, %v2552_v35 }
 0x770   : > { %v1411_v30 = vpop.permute.xlu2 %1410 }
 0x771   : > { %v2591_v1 = vmul.f32 %v3184_v33, %v2586_v38  ;;  %v2292_v38 = vsel %vm1162_vm3, %v4310_v7, %v2266_v59 }
 0x773   : > { %v2596_v45 = vadd.f32 %v3185_v36, %v2591_v1 }
 0x775   : > { %v2597_v46 = vpack.c.bf16 %v2596_v45, %v2595_v41 }
 0x777   : > { %3022 = vmatmul.msk.bf16.vlgmr.msrb.gmra.mxu0 %vm4561_vm4, %v2597_v46 }
 0x778   : > { %v2278_v32 = vpop.permute.xlu2 %2277 }
 0x780   : > { %v4399_v36 = vpop.permute.xlu2 %1422 }
 0x7f4   : > { %v2616_v4 = vpop.f32.mrf.mxu0 }
 0x7f5   : > { %v2621_v58 = vmax.f32 %v2616_v4, 0.0 }
 0x7fc   : > { %v2618_v35 = vpop.f32.mrf.mxu0 }
 0x7fd   : > { %v2622_v8 = vmax.f32 %v2618_v35, 0.0 }
 0x7ff   : > { %v2623_v27 = vpack.c.bf16 %v2622_v8, %v2621_v58 }
 0x801   : > { %3023 = vmatmul.msk.bf16.vlgmr.msrb.gmra.mxu1 %vm2636_vm6, %v2623_v27 }
 0x87e   : > { %v2649_v10 = vpop.f32.mrf.mxu1 }
 0x87f   : > { %v2650_v11 = vadd.f32 %v2649_v10, %v2595_v41 }
 0x881   : > { %v2656_v12 = vsel %vm4568_vm7, %v2650_v11, 0.0 }
 0x882   : > { %2657 = vadd.xlane.f32.xlu1 %v2656_v12 }
 0x886   : > { %v2651_v14 = vpop.f32.mrf.mxu1 }
 0x887   : > { %v2652_v13 = vadd.f32 %v2651_v14, %v2596_v45 }
 0x889   : > { %v2659_v44 = vsel %vm4569_vm9, %v2652_v13, 0.0 }
 0x88a   : > { %2660 = vadd.xlane.f32.xlu0 %v2659_v44 }
 0x89b   : > { %1406 = vrot.lane.b32.xlu1 %v4316_v9, %s3489_s30  ;;  %v2259_v9 = vsel %vm799_vm2, 0.0, %v2258_v19  ;;  %vm4572_vm2 = vmmov %vm4561_vm4 }
 0x89c   : > { %vm4576_vm6 = vmmov %vm4572_vm2 }
 0x89d   : > { %vm4577_vm9 = vmmov %vm4572_vm2 }
 0x89e   : > { %1402 = vrot.lane.b32.xlu0 %v1394_v17, %s3490_s14  ;;  %v3187_v17 = vld [vmem:[%s701_s0] ss:$0 sm:$0xff] }
 0x8a3   : > { %1414 = vrot.lane.b32.xlu1 %v1388_v55, %s3492_s10 }
 0x8a6   : > { %2269 = vrot.lane.b32.xlu0 %v2243_v56, %s3489_s30  ;;  %s4578_s30 = sld [smem:[#allocation37_spill]] }
 0x8ab   : > { %2281 = vrot.lane.b32.xlu1 %v2261_v18, %s3494_s8 }
 0x8ac   : > { %s2727_s10 = sshll.u32 %s4578_s30, 4  ;;  %s2728_s10 = int_to_ptr.hbm [resolvable:$true] %s2727_s10 }
 0x8ae   : > { %2273 = vrot.lane.b32.xlu0 %v2259_v9, %s3488_s26 }
 0x8b6   : > { %1418 = vrot.lane.b32.xlu0 %v1398_v6, %s3494_s8  ;;  %s3372_s8 = scalar_lea.hbm %s4575_s3, 16 }
 0x8be   : > { %2285 = vrot.lane.b32.xlu0 %v2255_v39, %s3493_s25  ;;  %s3496_s25 = smov [#allocation9]  }
 0x8bf   : > { %s4439_s27 = sshll.u32 %s3496_s25, 4  ;;  %s2726_s27 = int_to_ptr.vmem [resolvable:$true] %s4439_s27 }
 0x8f5   : > { %v2658_v20 = vpop.xlane.xlu1 %2657 }
 0x8f6   : > { %v2662_v40 = vmul.f32 %v2658_v20, %v4302_v49 }
 0x8f8   : > { %v4385_v21 = vsub.f32 %v2650_v11, %v2662_v40 }
 0x8fa   : > { %v2666_v52 = vmul.f32 %v4385_v21, %v4385_v21 }
 0x8fc   : > { %v2668_v23 = vsel %vm4570_vm10, %v2666_v52, 0.0 }
 0x8fd   : > { %v2661_v24 = vpop.xlane.xlu0 %2660  ;;  %2669 = vadd.xlane.f32.xlu2 %v2668_v23 }
 0x8fe   : > { %v2663_v25 = vmul.f32 %v2661_v24, %v4302_v49 }
 0x900   : > { %v4391_v61 = vsub.f32 %v2652_v13, %v2663_v25 }
 0x902   : > { %v2667_v48 = vmul.f32 %v4391_v61, %v4391_v61 }
 0x904   : > { %v2671_v42 = vsel %vm4571_vm11, %v2667_v48, 0.0 }
 0x905   : > { %2672 = vadd.xlane.f32.xlu1 %v2671_v42 }
 0x90d   : > { %v1407_v33 = vpop.permute.xlu1 %1406 }
 0x910   : > { %v1403_v29 = vpop.permute.xlu0 %1402 }
 0x911   : > { %v1429_v14 = vsel %vm1162_vm3, %v4363_v15, %v1403_v29 }
 0x912   : > { %v1431_v55 = vsel %vm1430_vm0, %v1429_v14, %v1407_v33 }
 0x913   : > { %v1433_v19 = vsel %vm1432_vm8, %v1431_v55, %v1411_v30 }
 0x915   : > { %2289 = vrot.lane.b32.xlu2 %v2263_v53, %s3495_s4  ;;  %v1415_v22 = vpop.permute.xlu1 %1414 }
 0x916   : > { %v1434_v9 = vsel %vm4576_vm6, %v1433_v19, %v1415_v22 }
 0x918   : > { %v2270_v31 = vpop.permute.xlu0 %2269 }
 0x919   : > { %v2293_v1 = vsel %vm1430_vm0, %v2292_v38, %v2270_v31 }
 0x91d   : > { %v2282_v57 = vpop.permute.xlu1 %2281 }
 0x91e   : > { %1426 = vrot.lane.b32.xlu1 %v1400_v28, %s3495_s4 }
 0x920   : > { %v2274_v34 = vpop.permute.xlu0 %2273 }
 0x921   : > { %v2294_v45 = vsel %vm1432_vm8, %v2293_v1, %v2274_v34 }
 0x922   : > { %v2295_v47 = vsel %vm4572_vm2, %v2294_v45, %v2278_v32 }
 0x923   : > { %v2296_v60 = vsel %vm1435_vm12, %v2295_v47, %v2282_v57 }
 0x928   : > { %v1419_v37 = vpop.permute.xlu0 %1418 }
 0x929   : > { %v1436_v6 = vsel %vm1435_vm12, %v1434_v9, %v1419_v37 }
 0x92a   : > { %v1438_v40 = vsel %vm1437_vm13, %v1436_v6, %v4399_v36 }
 0x930   : > { %v2286_v50 = vpop.permute.xlu0 %2285 }
 0x931   : > { %v2297_v7 = vsel %vm1437_vm13, %v2296_v60, %v2286_v50 }
 0x970   : > { %v2670_v41 = vpop.xlane.xlu2 %2669 }
 0x971   : > { %v2674_v46 = vmul.f32 %v2670_v41, %v4302_v49 }
 0x973   : > { %v2676_v51 = vadd.f32 1e-05, %v2674_v46 }
 0x975   : > { %3226 = vrsqrt.f32 %v2676_v51  ;;  %vm2684_vm15 = vweird.f32 %v2676_v51 }
 0x978   : > { %v2290_v0 = vpop.permute.xlu2 %2289  ;;  %v2673_v62 = vpop.xlane.xlu1 %2672 }
 0x979   : > { %v2298_v2 = vsel %vm1439_vm1, %v2297_v7, %v2290_v0  ;;  %v2675_v3 = vmul.f32 %v2673_v62, %v4302_v49  ;;  %v3186_v49 = vld [vmem:[%s698_s16] ss:$0 sm:$0xff]  ;;  %s2743_s16 = scalar_lea.hbm %s4575_s3, %s3037_s20 }
 0x97a   : > { %3016 = vst.msk [vmem:[%s3749_s7 + $0x4] sm:$0xf] %vm1441_vm14, %v2298_v2  ;;  %s2746_s29 = sshll.u32 %s2743_s16, 4  ;;  %s2747_s29 = int_to_ptr.hbm [resolvable:$true] %s2746_s29 }
 0x97b   : > { %v3227_v43 = vpop.eup %3226  ;;  %v2677_v4 = vadd.f32 1e-05, %v2675_v3  ;;  %s3366_s18 = sshra.s32 %s2747_s29, 4  ;;  %s3367_s18 = int_to_ptr.hbm [resolvable:$true] %s3366_s18 }
 0x97c   : > { %v2679_v35 = vmul.f32 %v3227_v43, %v2676_v51  ;;  %vm2685_vm5 = vweird.f32 %v3227_v43  ;;  %s3368_s9 = scalar_lea.hbm %s3367_s18, 8  ;;  %p3373_p0 = scmp.lt.s32.totalorder %s3367_s18, %s4575_s3 }
 0x97d   : > { %3228 = vrsqrt.f32 %v2677_v4  ;;  %vm2686_vm4 = vmor %vm2684_vm15, %vm2685_vm5  ;;  %vm2694_vm7 = vweird.f32 %v2677_v4  ;;  %p3369_p8 = scmp.ne.s32.totalorder %s3367_s18, %s3368_s9  ;;  %p3374_p3 = scmp.lt.s32.totalorder %s3372_s8, %s3368_s9 }
 0x97e   : > { %v2680_v58 = vmul.f32 %v3227_v43, %v2679_v35 }
 0x97f   : > { %p3370_p10 = pnand %p3369_p8, %p3651_p5  ;;  %p3375_p7 = por %p3374_p3, %p3373_p0 }
 0x980   : > { %v2681_v8 = vmul.f32 0.5, %v2680_v58 }
 0x981   : > { %p3371_p13 = pneg %p3370_p10 }
 0x982   : > { %v2682_v27 = vsub.f32 1.5, %v2681_v8 }
 0x983   : > { %v3229_v10 = vpop.eup %3228  ;;  %p3376_p9 = pnand %p3375_p7, %p3371_p13 }
 0x984   : > { %v2683_v11 = vmul.f32 %v3227_v43, %v2682_v27  ;;  %v2689_v12 = vmul.f32 %v3229_v10, %v2677_v4  ;;  %vm2695_vm3 = vweird.f32 %v3229_v10 }
 0x985   : > { %vm2696_vm0 = vmor %vm2694_vm7, %vm2695_vm3 }
 0x986   : > { %v2687_v13 = vsel %vm2686_vm4, %v3227_v43, %v2683_v11  ;;  %v2690_v44 = vmul.f32 %v3229_v10, %v2689_v12 }
 0x987   : > { %v2698_v16 = vmul.f32 %v2687_v13, %v4385_v21 }
 0x988   : > { %v2691_v15 = vmul.f32 0.5, %v2690_v44 }
 0x989   : > { %v2703_v56 = vmul.f32 %v3186_v49, %v2698_v16 }
 0x98a   : > { %v2692_v5 = vsub.f32 1.5, %v2691_v15 }
 0x98b   : > { %v2708_v18 = vadd.f32 %v3187_v17, %v2703_v56 }
 0x98c   : > { %v2693_v63 = vmul.f32 %v3229_v10, %v2692_v5 }
 0x98d   : > { %2710 = vst.msk [vmem:[#allocation9] sm:$0xff] %vm4577_vm9, %v2708_v18 }
 0x98e   : > { %v2697_v39 = vsel %vm2696_vm0, %v3229_v10, %v2693_v63 }
 0x98f   : > { %v2699_v20 = vmul.f32 %v2697_v39, %v4391_v61 }
 0x990   : > { %v1427_v21 = vpop.permute.xlu1 %1426 }
 0x991   : > { %v2704_v52 = vmul.f32 %v3186_v49, %v2699_v20  ;;  %v1440_v23 = vsel %vm1439_vm1, %v1438_v40, %v1427_v21 }
 0x992   : > { %1442 = vst.msk [vmem:[%s3749_s7] sm:$0xf] %vm1441_vm14, %v1440_v23 }
 0x993   : > { %v2709_v24 = vadd.f32 %v3187_v17, %v2704_v52 }
 0x994   : > { %3379 = shalt.err (!%p3376_p9)
}
 0x995   : > { %s3497_s5 = smov 64   ;;  %s3498_s24 = smov 4   ;;  %vm4580_vm8 = vmmov %vm4572_vm2 }
 0x996   : > { %3052 = dma.vmem_to_hbm [thread:$0]  (%p3651_p5), %s4442_s28, 128, %s2747_s29, %s2713_s15, %s3497_s5, %s3497_s5, %s3498_s24   ;;  %2711 = vst.msk [vmem:[#allocation9 + $0x8] sm:$0xff] %vm4580_vm8, %v2709_v24 }
 0x997   : > { %s3499_s23 = smov 128  }
 0x998   : > { %3051 = dma.vmem_to_hbm [thread:$0]  (%p400_p2), %s2726_s27, 256, %s2728_s10, [#allocation4], %s3499_s23, %s3499_s23, %s3490_s14  }
 0x999   : > { %3445 = dma.done.wait (%p400_p2), [#allocation4], 256  }
 0x99a   : > { %3447 = vsyncadd (%p400_p2), [#allocation4], 4294967040 }
 0x99b PF: > { %s4581_s20 = sld [smem:[#allocation17_spill]]  ;;  %p3071_p12 = pnand %p2979_p11, %p3615_p6 }
 0x99c   : > { %s4583_s13 = sld [smem:[#allocation21_spill]] }
 0x99d   : > { %p3072_p5 = pneg %p3071_p12 }
 0x9a1   : > { %s2766_s21 = sand.u32 1, %s4581_s20  }
 0x9a2   : > { %s2767_s17 = scalar_lea.sflag [#allocation11], %s2766_s21 }
 0x9a3   : > { %3449 = dma.done.wait (%p3072_p5), %s2767_s17, 128  }
 0x9a4   : > { %3451 = vsyncadd (%p3072_p5), %s2767_s17, 4294967168  ;;  %s30_s30 = sadd.s32 1, %s4583_s13   ;;  %s4584_s25 = sld [smem:[#allocation18_spill]] }
 0x9a5   : > { %p27_p1 = scmp.ge.s32.totalorder %s30_s30, 4   ;;  %s4585_s26 = sld [smem:[#allocation19_spill]] }
 0x9a6   : > { %s4586_s27 = sld [smem:[#allocation25_spill]] }
 0x9a7   : > { %s4587_s28 = sld [smem:[#allocation20_spill]]  ;;  %29 = sbr.rel (!%p27_p1) target bundleno = 21 (0x15), region = 172 }
 0x9a8   : > { %s4588_s29 = sld [smem:[#allocation24_spill]] }
 0x9ac   :  { %2773 = vsyncpa [#allocation3], 1 }
 0x9ad   :  { %2775 = vsyncpa [#allocation3 + $0x1], 1 }
 0x9ae   :  { %2776 = vsyncpa [#allocation6], 1 }
 0x9af   :  { %2777 = vsyncpa [#allocation4], 1 }
 0x9b0   :  { %2779 = vsyncpa [#allocation4 + $0x1], 1 }
 0x9b1   :  { %2780 = vsyncpa [#allocation11], 1 }
 0x9b2   :  { %2782 = vsyncpa [#allocation11 + $0x1], 1 }

</bundles_post_ra>
